<compile_context>
chip_gen: v7x
topology: tpu7x:2x2x1
jax: 0.10.0
libtpu: 0.0.40
codegen_flags: <defaults>
</compile_context>

<pallas_src>
import numpy as np
import jax
import jax.numpy as jnp
from jax.experimental import pallas as pl
from jax.experimental.pallas import tpu as pltpu

# ---- model dims -------------------------------------------------------------
L_IN = 178
XPAD = 256                    # input features padded to one 256-deep MXU pass
C1, K1, L1 = 6, 5, 174        # Conv1d(1,6,5):  (N,1,178) -> (N,6,174)
P1 = 87                       # MaxPool1d(2,2): -> (N,6,87)
C2, K2, L2 = 16, 5, 83        # Conv1d(6,16,5): -> (N,16,83)
P2 = 41                       # MaxPool1d(2,2): -> (N,16,41)
FLAT = C2 * P2                # 656 (PyTorch Flatten order: o*41 + p)
HID = 32
GATES = 3 * HID               # 96
GPAD = 128
HEAD_PAD = 128
OUT_PAD = 128                 # real logits live in columns 0..4
EPS = 1e-5

# ---- blocked-banded conv2 layout --------------------------------------------
NBLK = 6                      # pooled conv2 positions 0..40 -> 6 blocks of 8
BLK_P = 8                     # pooled conv2 positions per block (8*16 = 128 lanes/half)
BLK_S = 2 * BLK_P + K2 - 1    # 20 pooled-conv1 positions feeding one block
BLK_IN = 128                  # 20*6 = 120 used rows, padded to 128
P1_COLS = NBLK * BLK_IN       # 768 columns per even/odd conv1 half
FLAT_PAD = NBLK * 128         # 768-wide p2 (48 pooled positions x 16 ch, 41 real)


# ----------------------------------------------------------------------------
# Pallas kernel: whole forward pass for one batch tile.
# ----------------------------------------------------------------------------
def _myrnn_kernel(x_ref,
                  wc1_ref, bc1_ref,
                  wc2_ref, bc2_ref,
                  wg_ref, bg_ref, bhn_ref,
                  wf1_ref, bf1_ref,
                  wf2_ref, bf2_ref,
                  out_ref):
    f32, bf16 = jnp.float32, jnp.bfloat16

    x = x_ref[...]                                            # (TB, 256) bf16

    # Conv1d(1,6,5) + folded BatchNorm + ReLU + MaxPool(2,2).
    # Output columns are blocked time-major: [even | odd] halves, each 6 blocks
    # of 128 lanes (20 positions x 6 channels + pad), so the pool split and all
    # downstream slices are 128-lane aligned.
    h1 = jnp.dot(x, wc1_ref[...], preferred_element_type=f32) + bc1_ref[...]
    h1 = jnp.maximum(h1, 0.0)                                 # (TB, 1536)
    p1 = jnp.maximum(h1[:, :P1_COLS], h1[:, P1_COLS:]).astype(bf16)   # (TB, 768)

    # Conv1d(6,16,5) + ReLU + MaxPool(2,2): banded decomposition. Each 128-lane
    # block of p1 holds exactly the pooled-conv1 window needed by 8 pooled-conv2
    # positions, so one shared dense (128,256) weight computes the [even|odd]
    # conv2 outputs of every block.
    w2 = wc2_ref[...]                                         # (128, 256) bf16
    b2 = bc2_ref[...]                                         # (1, 256)   f32
    p2_parts = []
    for j in range(NBLK):
        h2 = jnp.dot(p1[:, j * BLK_IN:(j + 1) * BLK_IN], w2,
                     preferred_element_type=f32) + b2
        h2 = jnp.maximum(h2, 0.0)                             # (TB, 256)
        p2_parts.append(jnp.maximum(h2[:, :128], h2[:, 128:]))
    p2 = jnp.concatenate(p2_parts, axis=-1).astype(bf16)      # (TB, 768)

    # Linear(656,178) fused offline into the GRU input projection.
    # GRU(178,32), single step, h0 == 0:
    #   r = sigmoid(g_r), z = sigmoid(g_z), n = tanh(g_n + r*b_hn), h = (1-z)*n
    g = jnp.dot(p2, wg_ref[...], preferred_element_type=f32) + bg_ref[...]
    rz = jax.nn.sigmoid(g[:, :2 * HID])                       # r,z in one EUP pass
    r, z = rz[:, :HID], rz[:, HID:]
    n = jnp.tanh(g[:, 2 * HID:3 * HID] + r * bhn_ref[...])
    h = ((1.0 - z) * n).astype(bf16)                          # (TB, 32)

    # Dropout(0.2) is identity at inference; fc1+ReLU, fc2 (both 128-lane padded,
    # real logits are columns 0..4).
    f1 = jnp.maximum(jnp.dot(h, wf1_ref[...],
                             preferred_element_type=f32) + bf1_ref[...], 0.0)
    out_ref[...] = jnp.dot(f1.astype(bf16), wf2_ref[...],
                           preferred_element_type=f32) + bf2_ref[...]


# ----------------------------------------------------------------------------
# Parameter init (synthetic "PyTorch" params) and kernel-weight construction.
# ----------------------------------------------------------------------------
def init_torch_params(key):
    ks = jax.random.split(key, 18)
    p = {}
    p["bn_gamma"] = 1.0 + 0.1 * jax.random.normal(ks[0], (L_IN,), jnp.float32)
    p["bn_beta"] = 0.1 * jax.random.normal(ks[1], (L_IN,), jnp.float32)
    p["bn_rm"] = 0.1 * jax.random.normal(ks[2], (L_IN,), jnp.float32)
    p["bn_rv"] = 0.5 + jax.random.uniform(ks[3], (L_IN,), jnp.float32)
    p["conv1_w"] = 0.2 * jax.random.normal(ks[4], (C1, 1, K1), jnp.float32)
    p["conv1_b"] = 0.1 * jax.random.normal(ks[5], (C1,), jnp.float32)
    p["conv2_w"] = 0.1 * jax.random.normal(ks[6], (C2, C1, K2), jnp.float32)
    p["conv2_b"] = 0.1 * jax.random.normal(ks[7], (C2,), jnp.float32)
    p["cnnfc_w"] = 0.05 * jax.random.normal(ks[8], (L_IN, FLAT), jnp.float32)
    p["cnnfc_b"] = 0.05 * jax.random.normal(ks[9], (L_IN,), jnp.float32)
    p["gru_wih"] = 0.05 * jax.random.normal(ks[10], (3 * HID, L_IN), jnp.float32)
    p["gru_whh"] = 0.05 * jax.random.normal(ks[11], (3 * HID, HID), jnp.float32)  # unused: h0==0
    p["gru_bih"] = 0.05 * jax.random.normal(ks[12], (3 * HID,), jnp.float32)
    p["gru_bhh"] = 0.05 * jax.random.normal(ks[13], (3 * HID,), jnp.float32)
    p["fc1_w"] = 0.1 * jax.random.normal(ks[14], (16, HID), jnp.float32)
    p["fc1_b"] = 0.1 * jax.random.normal(ks[15], (16,), jnp.float32)
    p["fc2_w"] = 0.1 * jax.random.normal(ks[16], (5, 16), jnp.float32)
    p["fc2_b"] = 0.1 * jax.random.normal(ks[17], (5,), jnp.float32)
    return p


def _build_conv1_blocked(w1, b1, scale, shift):
    # Column (half, j, sl, c) = raw conv1 output at time t = 2*(16j+sl)+half for
    # channel c; BN scale/shift folded into the weights/bias. Positions s >= 87
    # (block padding) stay zero.
    W = np.zeros((XPAD, 2 * P1_COLS), np.float64)
    B = np.zeros((2 * P1_COLS,), np.float64)
    for half in range(2):                      # 0: even (t=2s), 1: odd (t=2s+1)
        for j in range(NBLK):
            for sl in range(BLK_S):
                s = 16 * j + sl                # pooled conv1 position
                if s >= P1:
                    continue
                t = 2 * s + half               # raw conv1 time index (< 174)
                for c in range(C1):
                    col = half * P1_COLS + j * BLK_IN + sl * C1 + c
                    bias = b1[c]
                    for k in range(K1):
                        W[t + k, col] = scale[t + k] * w1[c, 0, k]
                        bias += shift[t + k] * w1[c, 0, k]
                    B[col] = bias
    return W, B


def _build_conv2_block(w2, b2):
    # One dense (128, 256) weight shared by all 6 blocks. Row (sl, c) = local
    # pooled-conv1 position sl (0..19), channel c. Column (half, p_loc, o) =
    # conv2 output at time t = 2*p_loc+half (local), channel o. Padded output
    # positions (global p >= 41) produce garbage that is killed by zero wg rows.
    W = np.zeros((BLK_IN, 2 * 128), np.float64)
    B = np.zeros((2 * 128,), np.float64)
    for half in range(2):
        for p_loc in range(BLK_P):
            for o in range(C2):
                col = half * 128 + p_loc * C2 + o
                B[col] = b2[o]
                for c in range(C1):
                    for k in range(K2):
                        sl = 2 * p_loc + half + k          # 0..19
                        W[sl * C1 + c, col] = w2[o, c, k]
    return W, B


def build_kernel_params(p):
    q = {k: np.asarray(v, np.float64) for k, v in p.items()}

    # BatchNorm (eval mode) as scale/shift, folded into conv1.
    scale = q["bn_gamma"] / np.sqrt(q["bn_rv"] + EPS)
    shift = q["bn_beta"] - q["bn_rm"] * scale

    wc1, bc1 = _build_conv1_blocked(q["conv1_w"], q["conv1_b"], scale, shift)
    wc2, bc2 = _build_conv2_block(q["conv2_w"], q["conv2_b"])

    # Fuse Linear(656,178) into the GRU input projections and permute its rows
    # into the blocked p2 layout (block j, local pooled position, channel).
    Wg_in = q["gru_wih"].T                                   # (178, 96) cols [r|z|n]
    Wfused = q["cnnfc_w"].T @ Wg_in                          # (656, 96)
    bih, bhh = q["gru_bih"], q["gru_bhh"]
    bg_gate = np.concatenate([bih[:HID] + bhh[:HID],
                              bih[HID:2 * HID] + bhh[HID:2 * HID],
                              bih[2 * HID:]])
    bfused = q["cnnfc_b"] @ Wg_in + bg_gate                  # (96,)

    wg = np.zeros((FLAT_PAD, GPAD), np.float64)
    for j in range(NBLK):
        for p_loc in range(BLK_P):
            pp = 8 * j + p_loc
            if pp >= P2:
                continue                                      # padded position -> zero row
            for o in range(C2):
                wg[j * 128 + p_loc * C2 + o, :GATES] = Wfused[o * P2 + pp, :]
    bg = np.zeros((GPAD,), np.float64)
    bg[:GATES] = bfused
    bhn = bhh[2 * HID:]                                       # (32,)

    wf1 = np.zeros((HID, HEAD_PAD), np.float64)
    wf1[:, :16] = q["fc1_w"].T
    bf1 = np.zeros((HEAD_PAD,), np.float64)
    bf1[:16] = q["fc1_b"]
    wf2 = np.zeros((HEAD_PAD, OUT_PAD), np.float64)
    wf2[:16, :5] = q["fc2_w"].T
    bf2 = np.zeros((OUT_PAD,), np.float64)
    bf2[:5] = q["fc2_b"]

    return {
        "wc1": jnp.asarray(wc1, jnp.bfloat16),
        "bc1": jnp.asarray(bc1[None, :], jnp.float32),
        "wc2": jnp.asarray(wc2, jnp.bfloat16),
        "bc2": jnp.asarray(bc2[None, :], jnp.float32),
        "wg": jnp.asarray(wg, jnp.bfloat16),
        "bg": jnp.asarray(bg[None, :], jnp.float32),
        "bhn": jnp.asarray(bhn[None, :], jnp.float32),
        "wf1": jnp.asarray(wf1, jnp.bfloat16),
        "bf1": jnp.asarray(bf1[None, :], jnp.float32),
        "wf2": jnp.asarray(wf2, jnp.bfloat16),
        "bf2": jnp.asarray(bf2[None, :], jnp.float32),
    }


def _round_up(v, m):
    return ((v + m - 1) // m) * m


def myrnn_forward(x, kp, *, max_tb=512):
    # x: (N, 178, 1) float32  ->  (N, 5) float32
    n = x.shape[0]
    xb = x[:, :, 0].astype(jnp.float32)
    xb = jnp.pad(xb, ((0, 0), (0, XPAD - L_IN))).astype(jnp.bfloat16)   # (N, 256) bf16

    # Batch tile: multiple of 16 sublanes (bf16 packing); >=2 grid steps whenever
    # the batch allows so the "parallel" axis shards across both v7x TensorCores;
    # capped at max_tb so the ~13 MB peak stays inside a 32 MiB VMEM budget on
    # every TPU generation.
    tb = min(max_tb, _round_up(max((n + 1) // 2, 1), 16))
    n_pad = _round_up(n, tb)
    if n_pad != n:
        xb = jnp.pad(xb, ((0, n_pad - n), (0, 0)))

    weights = [kp["wc1"], kp["bc1"], kp["wc2"], kp["bc2"],
               kp["wg"], kp["bg"], kp["bhn"],
               kp["wf1"], kp["bf1"], kp["wf2"], kp["bf2"]]

    # TODO(synk): mark the constant-index weight specs pipeline_mode=pl.Buffered(1)
    # once single-buffering is confirmed supported; weights are now only ~1.1 MB
    # total so the double-buffer overhead is negligible.
    in_specs = [pl.BlockSpec((tb, XPAD), lambda i: (i, 0))]
    for w in weights:
        in_specs.append(pl.BlockSpec(w.shape, lambda i: (0, 0)))

    out = pl.pallas_call(
        _myrnn_kernel,
        out_shape=jax.ShapeDtypeStruct((n_pad, OUT_PAD), jnp.float32),
        grid=(n_pad // tb,),
        in_specs=in_specs,
        out_specs=pl.BlockSpec((tb, OUT_PAD), lambda i: (i, 0)),
        compiler_params=pltpu.CompilerParams(
            dimension_semantics=("parallel",),
            vmem_limit_bytes=32 * 1024 * 1024),
    )(xb, *weights)
    return out[:n, :5]


# ----------------------------------------------------------------------------
# Pure numpy reference (mirrors the PyTorch forward in eval mode).
# ----------------------------------------------------------------------------
def reference_forward(x, p):
    q = {k: np.asarray(v, np.float64) for k, v in p.items()}
    xb = np.asarray(x, np.float64)[:, :, 0]
    n = xb.shape[0]
    xbn = (xb - q["bn_rm"]) / np.sqrt(q["bn_rv"] + EPS) * q["bn_gamma"] + q["bn_beta"]
    w1, b1 = q["conv1_w"], q["conv1_b"]
    c1 = np.zeros((n, C1, L1))
    for c in range(C1):
        for t in range(L1):
            c1[:, c, t] = xbn[:, t:t + K1] @ w1[c, 0] + b1[c]
    c1 = np.maximum(c1, 0)
    p1 = np.maximum(c1[:, :, 0:2 * P1:2], c1[:, :, 1:2 * P1:2])
    w2, b2 = q["conv2_w"], q["conv2_b"]
    c2 = np.zeros((n, C2, L2))
    for o in range(C2):
        for t in range(L2):
            acc = np.full((n,), b2[o])
            for c in range(C1):
                acc = acc + p1[:, c, t:t + K2] @ w2[o, c]
            c2[:, o, t] = acc
    c2 = np.maximum(c2, 0)
    p2 = np.maximum(c2[:, :, 0:2 * P2:2], c2[:, :, 1:2 * P2:2])
    feat = p2.reshape(n, FLAT) @ q["cnnfc_w"].T + q["cnnfc_b"]
    gi = feat @ q["gru_wih"].T + q["gru_bih"]
    bhh = q["gru_bhh"]
    sig = lambda v: 1.0 / (1.0 + np.exp(-v))
    r = sig(gi[:, :HID] + bhh[:HID])
    z = sig(gi[:, HID:2 * HID] + bhh[HID:2 * HID])
    nn_ = np.tanh(gi[:, 2 * HID:] + r * bhh[2 * HID:])
    h = (1.0 - z) * nn_
    f1 = np.maximum(h @ q["fc1_w"].T + q["fc1_b"], 0)
    return f1 @ q["fc2_w"].T + q["fc2_b"]


if __name__ == "__main__":
    key = jax.random.PRNGKey(0)
    pkey, xkey = jax.random.split(key)
    params = init_torch_params(pkey)
    kparams = build_kernel_params(params)

    N = 8
    x = jax.random.normal(xkey, (N, L_IN, 1), jnp.float32)   # PyTorch (N, C=178, L=1)

    out = jax.block_until_ready(myrnn_forward(x, kparams))
    assert out.shape == (N, 5) and out.dtype == jnp.float32

    ref = reference_forward(np.asarray(x), params)
    if not np.allclose(np.asarray(out), ref, atol=5e-2, rtol=5e-2):
        raise AssertionError(
            f"mismatch, max abs err = {np.max(np.abs(np.asarray(out) - ref))}")
    print("KERNEL_OK")
</pallas_src>

<mosaic_0001>
module attributes {stable_mosaic.version = 11 : i64} {
  func.func @_myrnn_kernel(%arg0: i32, %arg1: memref<16x256xbf16, #tpu.memory_space<vmem>>, %arg2: memref<256x1536xbf16, #tpu.memory_space<vmem>>, %arg3: memref<1x1536xf32, #tpu.memory_space<vmem>>, %arg4: memref<128x256xbf16, #tpu.memory_space<vmem>>, %arg5: memref<1x256xf32, #tpu.memory_space<vmem>>, %arg6: memref<768x128xbf16, #tpu.memory_space<vmem>>, %arg7: memref<1x128xf32, #tpu.memory_space<vmem>>, %arg8: memref<1x32xf32, #tpu.memory_space<vmem>>, %arg9: memref<32x128xbf16, #tpu.memory_space<vmem>>, %arg10: memref<1x128xf32, #tpu.memory_space<vmem>>, %arg11: memref<128x128xbf16, #tpu.memory_space<vmem>>, %arg12: memref<1x128xf32, #tpu.memory_space<vmem>>, %arg13: memref<16x128xf32, #tpu.memory_space<vmem>>) attributes {dimension_semantics = [#tpu.dimension_semantics<parallel>], iteration_bounds = array<i64: 1>, scalar_prefetch = 0 : i64, scratch_operands = 0 : i64, tpu.core_type = #tpu.core_type<tc>, window_params = [{transform_indices = @transform_0, window_bounds = array<i64: 16, 256>}, {pipeline_mode = #tpu.pipeline_mode<synchronous>, transform_indices = @transform_1, window_bounds = array<i64: 256, 1536>}, {pipeline_mode = #tpu.pipeline_mode<synchronous>, transform_indices = @transform_2, window_bounds = array<i64: 1, 1536>}, {pipeline_mode = #tpu.pipeline_mode<synchronous>, transform_indices = @transform_3, window_bounds = array<i64: 128, 256>}, {pipeline_mode = #tpu.pipeline_mode<synchronous>, transform_indices = @transform_4, window_bounds = array<i64: 1, 256>}, {pipeline_mode = #tpu.pipeline_mode<synchronous>, transform_indices = @transform_5, window_bounds = array<i64: 768, 128>}, {pipeline_mode = #tpu.pipeline_mode<synchronous>, transform_indices = @transform_6, window_bounds = array<i64: 1, 128>}, {pipeline_mode = #tpu.pipeline_mode<synchronous>, transform_indices = @transform_7, window_bounds = array<i64: 1, 32>}, {pipeline_mode = #tpu.pipeline_mode<synchronous>, transform_indices = @transform_8, window_bounds = array<i64: 32, 128>}, {pipeline_mode = #tpu.pipeline_mode<synchronous>, transform_indices = @transform_9, window_bounds = array<i64: 1, 128>}, {pipeline_mode = #tpu.pipeline_mode<synchronous>, transform_indices = @transform_10, window_bounds = array<i64: 128, 128>}, {pipeline_mode = #tpu.pipeline_mode<synchronous>, transform_indices = @transform_11, window_bounds = array<i64: 1, 128>}, {transform_indices = @transform_12, window_bounds = array<i64: 16, 128>}]} {
    %c0 = arith.constant 0 : index
    %c0_0 = arith.constant 0 : index
    %0 = vector.load %arg1[%c0, %c0_0] : memref<16x256xbf16, #tpu.memory_space<vmem>>, vector<16x256xbf16>
    %c0_1 = arith.constant 0 : index
    %c0_2 = arith.constant 0 : index
    %1 = vector.load %arg2[%c0_1, %c0_2] : memref<256x1536xbf16, #tpu.memory_space<vmem>>, vector<256x1536xbf16>
    %cst = arith.constant dense<0.000000e+00> : vector<16x1536xf32>
    %2 = tpu.matmul %0, %1, %cst {dimension_numbers = #tpu.dot_dimension_numbers<[1], [0], [0], [1], [0, 0, 1, 1], [], []>} : vector<16x256xbf16>, vector<256x1536xbf16>, vector<16x1536xf32> -> vector<16x1536xf32>
    %c0_3 = arith.constant 0 : index
    %c0_4 = arith.constant 0 : index
    %3 = vector.load %arg3[%c0_3, %c0_4] : memref<1x1536xf32, #tpu.memory_space<vmem>>, vector<1x1536xf32>
    %4 = vector.broadcast %3 : vector<1x1536xf32> to vector<16x1536xf32>
    %5 = arith.addf %2, %4 : vector<16x1536xf32>
    %cst_5 = arith.constant 0.000000e+00 : f32
    %6 = vector.broadcast %cst_5 : f32 to vector<16x1536xf32>
    %7 = arith.maximumf %5, %6 : vector<16x1536xf32>
    %8 = vector.extract_strided_slice %7 {offsets = [0, 0], sizes = [16, 768], strides = [1, 1]} : vector<16x1536xf32> to vector<16x768xf32>
    %9 = vector.extract_strided_slice %7 {offsets = [0, 768], sizes = [16, 768], strides = [1, 1]} : vector<16x1536xf32> to vector<16x768xf32>
    %10 = arith.maximumf %8, %9 : vector<16x768xf32>
    %11 = arith.truncf %10 : vector<16x768xf32> to vector<16x768xbf16>
    %c0_6 = arith.constant 0 : index
    %c0_7 = arith.constant 0 : index
    %12 = vector.load %arg4[%c0_6, %c0_7] : memref<128x256xbf16, #tpu.memory_space<vmem>>, vector<128x256xbf16>
    %c0_8 = arith.constant 0 : index
    %c0_9 = arith.constant 0 : index
    %13 = vector.load %arg5[%c0_8, %c0_9] : memref<1x256xf32, #tpu.memory_space<vmem>>, vector<1x256xf32>
    %14 = vector.extract_strided_slice %11 {offsets = [0, 0], sizes = [16, 128], strides = [1, 1]} : vector<16x768xbf16> to vector<16x128xbf16>
    %cst_10 = arith.constant dense<0.000000e+00> : vector<16x256xf32>
    %15 = tpu.matmul %14, %12, %cst_10 {dimension_numbers = #tpu.dot_dimension_numbers<[1], [0], [0], [1], [0, 0, 1, 1], [], []>} : vector<16x128xbf16>, vector<128x256xbf16>, vector<16x256xf32> -> vector<16x256xf32>
    %16 = vector.broadcast %13 : vector<1x256xf32> to vector<16x256xf32>
    %17 = arith.addf %15, %16 : vector<16x256xf32>
    %cst_11 = arith.constant 0.000000e+00 : f32
    %18 = vector.broadcast %cst_11 : f32 to vector<16x256xf32>
    %19 = arith.maximumf %17, %18 : vector<16x256xf32>
    %20 = vector.extract_strided_slice %19 {offsets = [0, 0], sizes = [16, 128], strides = [1, 1]} : vector<16x256xf32> to vector<16x128xf32>
    %21 = vector.extract_strided_slice %19 {offsets = [0, 128], sizes = [16, 128], strides = [1, 1]} : vector<16x256xf32> to vector<16x128xf32>
    %22 = arith.maximumf %20, %21 : vector<16x128xf32>
    %23 = vector.extract_strided_slice %11 {offsets = [0, 128], sizes = [16, 128], strides = [1, 1]} : vector<16x768xbf16> to vector<16x128xbf16>
    %cst_12 = arith.constant dense<0.000000e+00> : vector<16x256xf32>
    %24 = tpu.matmul %23, %12, %cst_12 {dimension_numbers = #tpu.dot_dimension_numbers<[1], [0], [0], [1], [0, 0, 1, 1], [], []>} : vector<16x128xbf16>, vector<128x256xbf16>, vector<16x256xf32> -> vector<16x256xf32>
    %25 = vector.broadcast %13 : vector<1x256xf32> to vector<16x256xf32>
    %26 = arith.addf %24, %25 : vector<16x256xf32>
    %cst_13 = arith.constant 0.000000e+00 : f32
    %27 = vector.broadcast %cst_13 : f32 to vector<16x256xf32>
    %28 = arith.maximumf %26, %27 : vector<16x256xf32>
    %29 = vector.extract_strided_slice %28 {offsets = [0, 0], sizes = [16, 128], strides = [1, 1]} : vector<16x256xf32> to vector<16x128xf32>
    %30 = vector.extract_strided_slice %28 {offsets = [0, 128], sizes = [16, 128], strides = [1, 1]} : vector<16x256xf32> to vector<16x128xf32>
    %31 = arith.maximumf %29, %30 : vector<16x128xf32>
    %32 = vector.extract_strided_slice %11 {offsets = [0, 256], sizes = [16, 128], strides = [1, 1]} : vector<16x768xbf16> to vector<16x128xbf16>
    %cst_14 = arith.constant dense<0.000000e+00> : vector<16x256xf32>
    %33 = tpu.matmul %32, %12, %cst_14 {dimension_numbers = #tpu.dot_dimension_numbers<[1], [0], [0], [1], [0, 0, 1, 1], [], []>} : vector<16x128xbf16>, vector<128x256xbf16>, vector<16x256xf32> -> vector<16x256xf32>
    %34 = vector.broadcast %13 : vector<1x256xf32> to vector<16x256xf32>
    %35 = arith.addf %33, %34 : vector<16x256xf32>
    %cst_15 = arith.constant 0.000000e+00 : f32
    %36 = vector.broadcast %cst_15 : f32 to vector<16x256xf32>
    %37 = arith.maximumf %35, %36 : vector<16x256xf32>
    %38 = vector.extract_strided_slice %37 {offsets = [0, 0], sizes = [16, 128], strides = [1, 1]} : vector<16x256xf32> to vector<16x128xf32>
    %39 = vector.extract_strided_slice %37 {offsets = [0, 128], sizes = [16, 128], strides = [1, 1]} : vector<16x256xf32> to vector<16x128xf32>
    %40 = arith.maximumf %38, %39 : vector<16x128xf32>
    %41 = vector.extract_strided_slice %11 {offsets = [0, 384], sizes = [16, 128], strides = [1, 1]} : vector<16x768xbf16> to vector<16x128xbf16>
    %cst_16 = arith.constant dense<0.000000e+00> : vector<16x256xf32>
    %42 = tpu.matmul %41, %12, %cst_16 {dimension_numbers = #tpu.dot_dimension_numbers<[1], [0], [0], [1], [0, 0, 1, 1], [], []>} : vector<16x128xbf16>, vector<128x256xbf16>, vector<16x256xf32> -> vector<16x256xf32>
    %43 = vector.broadcast %13 : vector<1x256xf32> to vector<16x256xf32>
    %44 = arith.addf %42, %43 : vector<16x256xf32>
    %cst_17 = arith.constant 0.000000e+00 : f32
    %45 = vector.broadcast %cst_17 : f32 to vector<16x256xf32>
    %46 = arith.maximumf %44, %45 : vector<16x256xf32>
    %47 = vector.extract_strided_slice %46 {offsets = [0, 0], sizes = [16, 128], strides = [1, 1]} : vector<16x256xf32> to vector<16x128xf32>
    %48 = vector.extract_strided_slice %46 {offsets = [0, 128], sizes = [16, 128], strides = [1, 1]} : vector<16x256xf32> to vector<16x128xf32>
    %49 = arith.maximumf %47, %48 : vector<16x128xf32>
    %50 = vector.extract_strided_slice %11 {offsets = [0, 512], sizes = [16, 128], strides = [1, 1]} : vector<16x768xbf16> to vector<16x128xbf16>
    %cst_18 = arith.constant dense<0.000000e+00> : vector<16x256xf32>
    %51 = tpu.matmul %50, %12, %cst_18 {dimension_numbers = #tpu.dot_dimension_numbers<[1], [0], [0], [1], [0, 0, 1, 1], [], []>} : vector<16x128xbf16>, vector<128x256xbf16>, vector<16x256xf32> -> vector<16x256xf32>
    %52 = vector.broadcast %13 : vector<1x256xf32> to vector<16x256xf32>
    %53 = arith.addf %51, %52 : vector<16x256xf32>
    %cst_19 = arith.constant 0.000000e+00 : f32
    %54 = vector.broadcast %cst_19 : f32 to vector<16x256xf32>
    %55 = arith.maximumf %53, %54 : vector<16x256xf32>
    %56 = vector.extract_strided_slice %55 {offsets = [0, 0], sizes = [16, 128], strides = [1, 1]} : vector<16x256xf32> to vector<16x128xf32>
    %57 = vector.extract_strided_slice %55 {offsets = [0, 128], sizes = [16, 128], strides = [1, 1]} : vector<16x256xf32> to vector<16x128xf32>
    %58 = arith.maximumf %56, %57 : vector<16x128xf32>
    %59 = vector.extract_strided_slice %11 {offsets = [0, 640], sizes = [16, 128], strides = [1, 1]} : vector<16x768xbf16> to vector<16x128xbf16>
    %cst_20 = arith.constant dense<0.000000e+00> : vector<16x256xf32>
    %60 = tpu.matmul %59, %12, %cst_20 {dimension_numbers = #tpu.dot_dimension_numbers<[1], [0], [0], [1], [0, 0, 1, 1], [], []>} : vector<16x128xbf16>, vector<128x256xbf16>, vector<16x256xf32> -> vector<16x256xf32>
    %61 = vector.broadcast %13 : vector<1x256xf32> to vector<16x256xf32>
    %62 = arith.addf %60, %61 : vector<16x256xf32>
    %cst_21 = arith.constant 0.000000e+00 : f32
    %63 = vector.broadcast %cst_21 : f32 to vector<16x256xf32>
    %64 = arith.maximumf %62, %63 : vector<16x256xf32>
    %65 = vector.extract_strided_slice %64 {offsets = [0, 0], sizes = [16, 128], strides = [1, 1]} : vector<16x256xf32> to vector<16x128xf32>
    %66 = vector.extract_strided_slice %64 {offsets = [0, 128], sizes = [16, 128], strides = [1, 1]} : vector<16x256xf32> to vector<16x128xf32>
    %67 = arith.maximumf %65, %66 : vector<16x128xf32>
    %68 = tpu.concatenate %22, %31, %40, %49, %58, %67 in 1 : vector<16x128xf32>, vector<16x128xf32>, vector<16x128xf32>, vector<16x128xf32>, vector<16x128xf32>, vector<16x128xf32> -> vector<16x768xf32>
    %69 = arith.truncf %68 : vector<16x768xf32> to vector<16x768xbf16>
    %c0_22 = arith.constant 0 : index
    %c0_23 = arith.constant 0 : index
    %70 = vector.load %arg6[%c0_22, %c0_23] : memref<768x128xbf16, #tpu.memory_space<vmem>>, vector<768x128xbf16>
    %cst_24 = arith.constant dense<0.000000e+00> : vector<16x128xf32>
    %71 = tpu.matmul %69, %70, %cst_24 {dimension_numbers = #tpu.dot_dimension_numbers<[1], [0], [0], [1], [0, 0, 1, 1], [], []>} : vector<16x768xbf16>, vector<768x128xbf16>, vector<16x128xf32> -> vector<16x128xf32>
    %c0_25 = arith.constant 0 : index
    %c0_26 = arith.constant 0 : index
    %72 = vector.load %arg7[%c0_25, %c0_26] : memref<1x128xf32, #tpu.memory_space<vmem>>, vector<1x128xf32>
    %73 = vector.broadcast %72 : vector<1x128xf32> to vector<16x128xf32>
    %74 = arith.addf %71, %73 : vector<16x128xf32>
    %75 = vector.extract_strided_slice %74 {offsets = [0, 0], sizes = [16, 64], strides = [1, 1]} : vector<16x128xf32> to vector<16x64xf32>
    %76 = arith.negf %75 : vector<16x64xf32>
    %77 = math.exp %76 : vector<16x64xf32>
    %cst_27 = arith.constant 1.000000e+00 : f32
    %78 = vector.broadcast %cst_27 : f32 to vector<16x64xf32>
    %79 = arith.addf %78, %77 : vector<16x64xf32>
    %80 = arith.divf %78, %79 : vector<16x64xf32>
    %81 = vector.extract_strided_slice %80 {offsets = [0, 0], sizes = [16, 32], strides = [1, 1]} : vector<16x64xf32> to vector<16x32xf32>
    %82 = vector.extract_strided_slice %80 {offsets = [0, 32], sizes = [16, 32], strides = [1, 1]} : vector<16x64xf32> to vector<16x32xf32>
    %83 = vector.extract_strided_slice %74 {offsets = [0, 64], sizes = [16, 32], strides = [1, 1]} : vector<16x128xf32> to vector<16x32xf32>
    %c0_28 = arith.constant 0 : index
    %c0_29 = arith.constant 0 : index
    %84 = vector.load %arg8[%c0_28, %c0_29] : memref<1x32xf32, #tpu.memory_space<vmem>>, vector<1x32xf32>
    %85 = vector.broadcast %84 : vector<1x32xf32> to vector<16x32xf32>
    %86 = arith.mulf %81, %85 : vector<16x32xf32>
    %87 = arith.addf %83, %86 : vector<16x32xf32>
    %88 = math.tanh %87 : vector<16x32xf32>
    %cst_30 = arith.constant 1.000000e+00 : f32
    %89 = vector.broadcast %cst_30 : f32 to vector<16x32xf32>
    %90 = arith.subf %89, %82 : vector<16x32xf32>
    %91 = arith.mulf %90, %88 : vector<16x32xf32>
    %92 = arith.truncf %91 : vector<16x32xf32> to vector<16x32xbf16>
    %c0_31 = arith.constant 0 : index
    %c0_32 = arith.constant 0 : index
    %93 = vector.load %arg9[%c0_31, %c0_32] : memref<32x128xbf16, #tpu.memory_space<vmem>>, vector<32x128xbf16>
    %cst_33 = arith.constant dense<0.000000e+00> : vector<16x128xf32>
    %94 = tpu.matmul %92, %93, %cst_33 {dimension_numbers = #tpu.dot_dimension_numbers<[1], [0], [0], [1], [0, 0, 1, 1], [], []>} : vector<16x32xbf16>, vector<32x128xbf16>, vector<16x128xf32> -> vector<16x128xf32>
    %c0_34 = arith.constant 0 : index
    %c0_35 = arith.constant 0 : index
    %95 = vector.load %arg10[%c0_34, %c0_35] : memref<1x128xf32, #tpu.memory_space<vmem>>, vector<1x128xf32>
    %96 = vector.broadcast %95 : vector<1x128xf32> to vector<16x128xf32>
    %97 = arith.addf %94, %96 : vector<16x128xf32>
    %cst_36 = arith.constant 0.000000e+00 : f32
    %98 = vector.broadcast %cst_36 : f32 to vector<16x128xf32>
    %99 = arith.maximumf %97, %98 : vector<16x128xf32>
    %100 = arith.truncf %99 : vector<16x128xf32> to vector<16x128xbf16>
    %c0_37 = arith.constant 0 : index
    %c0_38 = arith.constant 0 : index
    %101 = vector.load %arg11[%c0_37, %c0_38] : memref<128x128xbf16, #tpu.memory_space<vmem>>, vector<128x128xbf16>
    %cst_39 = arith.constant dense<0.000000e+00> : vector<16x128xf32>
    %102 = tpu.matmul %100, %101, %cst_39 {dimension_numbers = #tpu.dot_dimension_numbers<[1], [0], [0], [1], [0, 0, 1, 1], [], []>} : vector<16x128xbf16>, vector<128x128xbf16>, vector<16x128xf32> -> vector<16x128xf32>
    %c0_40 = arith.constant 0 : index
    %c0_41 = arith.constant 0 : index
    %103 = vector.load %arg12[%c0_40, %c0_41] : memref<1x128xf32, #tpu.memory_space<vmem>>, vector<1x128xf32>
    %104 = vector.broadcast %103 : vector<1x128xf32> to vector<16x128xf32>
    %105 = arith.addf %102, %104 : vector<16x128xf32>
    %c0_42 = arith.constant 0 : index
    %c0_43 = arith.constant 0 : index
    %106 = vector.load %arg13[%c0_42, %c0_43] : memref<16x128xf32, #tpu.memory_space<vmem>>, vector<16x128xf32>
    tpu.vector_store %arg13[%c0_42, %c0_43], %105 {strides = array<i32>} : memref<16x128xf32, #tpu.memory_space<vmem>>, vector<16x128xf32>,
    return
  }
  func.func @transform_0(%arg0: i32) -> (i32, i32) {
    %c0_i32 = arith.constant 0 : i32
    %c0_i32_0 = arith.constant 0 : i32
    return %arg0, %c0_i32 : i32, i32
  }
  func.func @transform_1(%arg0: i32) -> (i32, i32) {
    %c0_i32 = arith.constant 0 : i32
    %c0_i32_0 = arith.constant 0 : i32
    %c0_i32_1 = arith.constant 0 : i32
    return %c0_i32, %c0_i32_0 : i32, i32
  }
  func.func @transform_2(%arg0: i32) -> (i32, i32) {
    %c0_i32 = arith.constant 0 : i32
    %c0_i32_0 = arith.constant 0 : i32
    %c0_i32_1 = arith.constant 0 : i32
    return %c0_i32, %c0_i32_0 : i32, i32
  }
  func.func @transform_3(%arg0: i32) -> (i32, i32) {
    %c0_i32 = arith.constant 0 : i32
    %c0_i32_0 = arith.constant 0 : i32
    %c0_i32_1 = arith.constant 0 : i32
    return %c0_i32, %c0_i32_0 : i32, i32
  }
  func.func @transform_4(%arg0: i32) -> (i32, i32) {
    %c0_i32 = arith.constant 0 : i32
    %c0_i32_0 = arith.constant 0 : i32
    %c0_i32_1 = arith.constant 0 : i32
    return %c0_i32, %c0_i32_0 : i32, i32
  }
  func.func @transform_5(%arg0: i32) -> (i32, i32) {
    %c0_i32 = arith.constant 0 : i32
    %c0_i32_0 = arith.constant 0 : i32
    %c0_i32_1 = arith.constant 0 : i32
    return %c0_i32, %c0_i32_0 : i32, i32
  }
  func.func @transform_6(%arg0: i32) -> (i32, i32) {
    %c0_i32 = arith.constant 0 : i32
    %c0_i32_0 = arith.constant 0 : i32
    %c0_i32_1 = arith.constant 0 : i32
    return %c0_i32, %c0_i32_0 : i32, i32
  }
  func.func @transform_7(%arg0: i32) -> (i32, i32) {
    %c0_i32 = arith.constant 0 : i32
    %c0_i32_0 = arith.constant 0 : i32
    %c0_i32_1 = arith.constant 0 : i32
    return %c0_i32, %c0_i32_0 : i32, i32
  }
  func.func @transform_8(%arg0: i32) -> (i32, i32) {
    %c0_i32 = arith.constant 0 : i32
    %c0_i32_0 = arith.constant 0 : i32
    %c0_i32_1 = arith.constant 0 : i32
    return %c0_i32, %c0_i32_0 : i32, i32
  }
  func.func @transform_9(%arg0: i32) -> (i32, i32) {
    %c0_i32 = arith.constant 0 : i32
    %c0_i32_0 = arith.constant 0 : i32
    %c0_i32_1 = arith.constant 0 : i32
    return %c0_i32, %c0_i32_0 : i32, i32
  }
  func.func @transform_10(%arg0: i32) -> (i32, i32) {
    %c0_i32 = arith.constant 0 : i32
    %c0_i32_0 = arith.constant 0 : i32
    %c0_i32_1 = arith.constant 0 : i32
    return %c0_i32, %c0_i32_0 : i32, i32
  }
  func.func @transform_11(%arg0: i32) -> (i32, i32) {
    %c0_i32 = arith.constant 0 : i32
    %c0_i32_0 = arith.constant 0 : i32
    %c0_i32_1 = arith.constant 0 : i32
    return %c0_i32, %c0_i32_0 : i32, i32
  }
  func.func @transform_12(%arg0: i32) -> (i32, i32) {
    %c0_i32 = arith.constant 0 : i32
    %c0_i32_0 = arith.constant 0 : i32
    return %arg0, %c0_i32 : i32, i32
  }
}

</mosaic_0001>

<bundles_post_ra>
// kernel: tpu_custom_call.1
= control target key start
LH: loop header
LB: loop body
LE: loop exit
PB: predicated region body
PF: predicated region fallthrough
CT: control target
= control target key end

     0   :  { %17 = vsyncpa [#allocation3], 0  ;;  %s4210_s0 = inlined_call_operand.hbm [shape: bf16[16,256], index: 0, kind: input, shape index: {}]   ;;  %s4211_s1 = inlined_call_operand.hbm [shape: bf16[256,1536], index: 1, kind: input, shape index: {}]   ;;  %s4212_s2 = inlined_call_operand.hbm [shape: f32[1,1536], index: 2, kind: input, shape index: {}]   ;;  %s4213_s3 = inlined_call_operand.hbm [shape: bf16[128,256], index: 3, kind: input, shape index: {}]   ;;  %s4214_s4 = inlined_call_operand.vmem [shape: f32[1,256], index: 4, kind: input, shape index: {}]   ;;  %s4215_s5 = inlined_call_operand.hbm [shape: bf16[768,128], index: 5, kind: input, shape index: {}]   ;;  %s4216_s6 = inlined_call_operand.vmem [shape: f32[1,128], index: 6, kind: input, shape index: {}]   ;;  %s4217_s7 = inlined_call_operand.vmem [shape: f32[1,32], index: 7, kind: input, shape index: {}]   ;;  %s4218_s8 = inlined_call_operand.vmem [shape: bf16[32,128], index: 8, kind: input, shape index: {}]   ;;  %s4219_s9 = inlined_call_operand.vmem [shape: f32[1,128], index: 9, kind: input, shape index: {}]   ;;  %s4220_s10 = inlined_call_operand.hbm [shape: bf16[128,128], index: 10, kind: input, shape index: {}]   ;;  %s4221_s11 = inlined_call_operand.vmem [shape: f32[1,128], index: 11, kind: input, shape index: {}]   ;;  %s4222_s12 = inlined_call_operand.hbm [shape: f32[16,128], index: 12, kind: output, shape index: {}]  }
   0x1   :  { %18 = vsyncpa [#allocation6], 0 }
   0x2   :  { %19 = vsyncpa [#allocation9], 0 }
   0x3   :  { %20 = vsyncpa [#allocation12], 0 }
   0x4   :  { %21 = vsyncpa [#allocation4], 0  ;;  %s3774_s21 = smov [#allocation5]   ;;  %s3610_s25 = scalar_lea.hbm %s4211_s1, 24576 }
   0x5   :  { %s39_s22 = sshll.u32 %s3774_s21, 4  ;;  %p3611_p0 = scmp.ne.s32.totalorder %s4211_s1, %s3610_s25  ;;  %s40_s22 = int_to_ptr.vmem [resolvable:$true] %s39_s22 }
   0x6   :  { %p3614_p1 = scmp.lt.u32.totalorder %s3610_s25, %s4211_s1 }
   0x8   :  { %p3616_p2 = pnand %p3614_p1, %p3611_p0 }
   0xa   :  { %3619 = shalt.err (!%p3616_p2)
}
   0xb   :  { %s3620_s30 = scalar_lea.vmem %s40_s22, 24576  ;;  %p3625_p4 = scmp.lt.s32.totalorder %s40_s22, %s40_s22 }
   0xc   :  { %p3621_p3 = scmp.ne.s32.totalorder %s40_s22, %s3620_s30  ;;  %p3626_p5 = scmp.lt.s32.totalorder %s3620_s30, %s3620_s30 }
   0xe   :  { %p3627_p6 = por %p3626_p5, %p3625_p4 }
  0x10   :  { %p3628_p7 = pnand %p3627_p6, %p3621_p3 }
  0x12   :  { %3631 = shalt.err (!%p3628_p7)
}
  0x13   :  { %s3775_s13 = smov 768   ;;  %s3776_s14 = smov 48  }
  0x14   :  { %45 = dma.hbm_to_vmem [thread:$0]  %s4211_s1, 24576, %s40_s22, [#allocation6], %s3775_s13, %s3775_s13, %s3776_s14  }
  0x15   :  { %s3777_s17 = smov [#allocation8]   ;;  %s3778_s19 = smov [#allocation2]  }
  0x16   :  { %s61_s18 = sshll.u32 %s3777_s17, 4  ;;  %s27_s20 = sshll.u32 %s3778_s19, 4  ;;  %s62_s18 = int_to_ptr.vmem [resolvable:$true] %s61_s18  ;;  %s28_s20 = int_to_ptr.vmem [resolvable:$true] %s27_s20 }
  0x17   :  { %s3632_s24 = scalar_lea.hbm %s4213_s3, 2048 }
  0x18   :  { %p3633_p8 = scmp.ne.s32.totalorder %s4213_s3, %s3632_s24  ;;  %p3636_p9 = scmp.lt.u32.totalorder %s3632_s24, %s4213_s3 }
  0x1a   :  { %p3638_p10 = pnand %p3636_p9, %p3633_p8 }
  0x1c   :  { %3641 = shalt.err (!%p3638_p10)
}
  0x1d   :  { %s3642_s1 = scalar_lea.vmem %s62_s18, 2048  ;;  %p3647_p12 = scmp.lt.s32.totalorder %s62_s18, %s62_s18 }
  0x1e   :  { %p3643_p11 = scmp.ne.s32.totalorder %s62_s18, %s3642_s1  ;;  %p3648_p13 = scmp.lt.s32.totalorder %s3642_s1, %s3642_s1 }
  0x20   :  { %p3649_p0 = por %p3648_p13, %p3647_p12 }
  0x22   :  { %p3650_p1 = pnand %p3649_p0, %p3643_p11 }
  0x24   :  { %3653 = shalt.err (!%p3650_p1)
}
  0x25   :  { %s3779_s22 = smov 128   ;;  %s3780_s29 = smov 8  }
  0x26   :  { %67 = dma.hbm_to_vmem [thread:$0]  %s4213_s3, 2048, %s62_s18, [#allocation9], %s3779_s22, %s3779_s22, %s3780_s29  }
  0x27   :  { %s3654_s16 = scalar_lea.hbm %s4210_s0, 256 }
  0x28   :  { %p3655_p2 = scmp.ne.s32.totalorder %s4210_s0, %s3654_s16  ;;  %p3658_p3 = scmp.lt.u32.totalorder %s3654_s16, %s4210_s0 }
  0x2a   :  { %p3660_p4 = pnand %p3658_p3, %p3655_p2 }
  0x2c   :  { %3663 = shalt.err (!%p3660_p4)
}
  0x2d   :  { %s3664_s24 = scalar_lea.vmem %s28_s20, 256  ;;  %p3669_p6 = scmp.lt.s32.totalorder %s28_s20, %s28_s20 }
  0x2e   :  { %p3665_p5 = scmp.ne.s32.totalorder %s28_s20, %s3664_s24  ;;  %p3670_p7 = scmp.lt.s32.totalorder %s3664_s24, %s3664_s24 }
  0x30   :  { %p3671_p8 = por %p3670_p7, %p3669_p6 }
  0x32   :  { %p3672_p9 = pnand %p3671_p8, %p3665_p5 }
  0x34   :  { %3675 = shalt.err (!%p3672_p9)
}
  0x35   :  { %33 = dma.hbm_to_vmem [thread:$0]  %s4210_s0, 256, %s28_s20, [#allocation3], %s3779_s22, %s3779_s22, %s3780_s29  }
  0x36   :  { %s3781_s25 = smov [#allocation7]   ;;  %s3782_s27 = smov [#allocation10]  }
  0x37   :  { %s52_s26 = sshll.u32 %s3781_s25, 4  ;;  %s75_s28 = sshll.u32 %s3782_s27, 4  ;;  %s53_s26 = int_to_ptr.vmem [resolvable:$true] %s52_s26  ;;  %s76_s28 = int_to_ptr.vmem [resolvable:$true] %s75_s28 }
  0x38   :  { %s3676_s13 = scalar_lea.hbm %s4212_s2, 192 }
  0x39   :  { %p3677_p10 = scmp.ne.s32.totalorder %s4212_s2, %s3676_s13  ;;  %p3680_p11 = scmp.lt.u32.totalorder %s3676_s13, %s4212_s2 }
  0x3b   :  { %p3682_p12 = pnand %p3680_p11, %p3677_p10 }
  0x3d   :  { %3685 = shalt.err (!%p3682_p12)
}
  0x3e   :  { %s3686_s0 = scalar_lea.vmem %s53_s26, 192  ;;  %p3691_p0 = scmp.lt.s32.totalorder %s53_s26, %s53_s26 }
  0x3f   :  { %p3687_p13 = scmp.ne.s32.totalorder %s53_s26, %s3686_s0  ;;  %p3692_p1 = scmp.lt.s32.totalorder %s3686_s0, %s3686_s0 }
  0x41   :  { %p3693_p2 = por %p3692_p1, %p3691_p0 }
  0x43   :  { %p3694_p3 = pnand %p3693_p2, %p3687_p13 }
  0x45   :  { %3697 = shalt.err (!%p3694_p3)
}
  0x46   :  { %55 = dma.hbm_to_vmem [thread:$0]  %s4212_s2, 192, %s53_s26, [#allocation6]  }
  0x47   :  { %s3698_s24 = scalar_lea.hbm %s4215_s5, 6144 }
  0x48   :  { %p3699_p4 = scmp.ne.s32.totalorder %s4215_s5, %s3698_s24  ;;  %p3702_p5 = scmp.lt.u32.totalorder %s3698_s24, %s4215_s5 }
  0x4a   :  { %p3704_p6 = pnand %p3702_p5, %p3699_p4 }
  0x4c   :  { %3707 = shalt.err (!%p3704_p6)
}
  0x4d   :  { %s3708_s1 = scalar_lea.vmem %s76_s28, 6144  ;;  %p3713_p8 = scmp.lt.s32.totalorder %s76_s28, %s76_s28 }
  0x4e   :  { %p3709_p7 = scmp.ne.s32.totalorder %s76_s28, %s3708_s1  ;;  %p3714_p9 = scmp.lt.s32.totalorder %s3708_s1, %s3708_s1 }
  0x50   :  { %p3715_p10 = por %p3714_p9, %p3713_p8 }
  0x52   :  { %p3716_p11 = pnand %p3715_p10, %p3709_p7 }
  0x54   :  { %3719 = shalt.err (!%p3716_p11)
}
  0x55   :  { %s3783_s2 = smov 64   ;;  %s3784_s26 = smov 4  }
  0x56   :  { %81 = dma.hbm_to_vmem [thread:$0]  %s4215_s5, 6144, %s76_s28, [#allocation9], %s3783_s2, %s3783_s2, %s3784_s26  }
  0x57   :  { %s3785_s14 = smov [#allocation11]   ;;  %s3720_s0 = scalar_lea.hbm %s4220_s10, 1024 }
  0x58   :  { %s95_s15 = sshll.u32 %s3785_s14, 4  ;;  %p3721_p12 = scmp.ne.s32.totalorder %s4220_s10, %s3720_s0  ;;  %s96_s15 = int_to_ptr.vmem [resolvable:$true] %s95_s15 }
  0x59   :  { %p3724_p13 = scmp.lt.u32.totalorder %s3720_s0, %s4220_s10 }
  0x5b   :  { %p3726_p0 = pnand %p3724_p13, %p3721_p12 }
  0x5d   :  { %3729 = shalt.err (!%p3726_p0)
}
  0x5e   :  { %s3730_s24 = scalar_lea.vmem %s96_s15, 1024  ;;  %p3735_p2 = scmp.lt.s32.totalorder %s96_s15, %s96_s15 }
  0x5f   :  { %p3731_p1 = scmp.ne.s32.totalorder %s96_s15, %s3730_s24  ;;  %p3736_p3 = scmp.lt.s32.totalorder %s3730_s24, %s3730_s24 }
  0x61   :  { %p3737_p4 = por %p3736_p3, %p3735_p2 }
  0x63   :  { %p3738_p5 = pnand %p3737_p4, %p3731_p1 }
  0x65   :  { %3741 = shalt.err (!%p3738_p5)
}
  0x66   :  { %101 = dma.hbm_to_vmem [thread:$0]  %s4220_s10, 1024, %s96_s15, [#allocation12], %s3783_s2, %s3783_s2, %s3784_s26  }
  0x67   :  { %3764 = dma.done.wait [#allocation3], 256  }
  0x68   :  { %3765 = vsyncadd [#allocation3], 4294967040 }
  0x69   :  { %3766 = dma.done.wait [#allocation6], 24768  }
  0x6a   :  { %3767 = vsyncadd [#allocation6], 4294942528 }
  0x6b   :  { %3768 = dma.done.wait [#allocation9], 8192  }
  0x6c   :  { %3769 = vsyncadd [#allocation9], 4294959104 }
  0x6d   :  { %3770 = dma.done.wait [#allocation12], 1024  }
  0x6e   :  { %3771 = vsyncadd [#allocation12], 4294966272  ;;  %v3225_v0 = vld [vmem:[#allocation5 + $0x4] ss:$48 sps:$4 sm:$0xff]   ;;  %v3227_v1 = vld [vmem:[#allocation5 + $0xc] ss:$48 sps:$4 sm:$0xff]  }
  0x6f   :  { %1351 = vmatprep.subr.bf16.mxu0 %v3225_v0  ;;  %v3229_v2 = vld [vmem:[#allocation5] ss:$48 sps:$4 sm:$0xff]   ;;  %v3230_v3 = vld [vmem:[#allocation5 + $0x8] ss:$48 sps:$4 sm:$0xff]   ;;  %1394 = vmatprep.subr.bf16.mxu1 %v3227_v1  ;;  %v3231_v4 = vld [vmem:[#allocation5 + $0x64] ss:$48 sps:$4 sm:$0xff]  }
  0x70   :  { %1352 = vmatpush1.bf16.msra.mxu0 %v3229_v2  ;;  %1395 = vmatpush1.bf16.msra.mxu1 %v3230_v3  ;;  %v3233_v5 = vld [vmem:[#allocation5 + $0x6c] ss:$48 sps:$4 sm:$0xff]   ;;  %v3235_v6 = vld [vmem:[#allocation5 + $0x60] ss:$48 sps:$4 sm:$0xff]   ;;  %v3236_v7 = vld [vmem:[#allocation5 + $0x68] ss:$48 sps:$4 sm:$0xff]  }
  0x71   :  { %1353 = vmatprep.subr.bf16.mxu0 %v3231_v4  ;;  %1396 = vmatprep.subr.bf16.mxu1 %v3233_v5  ;;  %v3237_v8 = vld [vmem:[#allocation5 + $0xc4] ss:$48 sps:$4 sm:$0xff]   ;;  %v3239_v9 = vld [vmem:[#allocation5 + $0xcc] ss:$48 sps:$4 sm:$0xff]   ;;  %v3241_v10 = vld [vmem:[#allocation5 + $0xc0] ss:$48 sps:$4 sm:$0xff]  }
  0x72   :  { %v3242_v11 = vld [vmem:[#allocation5 + $0xc8] ss:$48 sps:$4 sm:$0xff]   ;;  %v3243_v12 = vld [vmem:[#allocation5 + $0x124] ss:$48 sps:$4 sm:$0xff]   ;;  %v3245_v13 = vld [vmem:[#allocation5 + $0x12c] ss:$48 sps:$4 sm:$0xff]  }
  0x73   :  { %v3247_v14 = vld [vmem:[#allocation5 + $0x120] ss:$48 sps:$4 sm:$0xff]   ;;  %v3248_v15 = vld [vmem:[#allocation5 + $0x128] ss:$48 sps:$4 sm:$0xff]   ;;  %v3249_v16 = vld [vmem:[#allocation5 + $0x184] ss:$48 sps:$4 sm:$0xff]  }
  0x74   :  { %1354 = vmatpush1.bf16.msra.mxu0 %v3235_v6  ;;  %1397 = vmatpush1.bf16.msra.mxu1 %v3236_v7  ;;  %v3251_v17 = vld [vmem:[#allocation5 + $0x18c] ss:$48 sps:$4 sm:$0xff]   ;;  %v3253_v18 = vld [vmem:[#allocation5 + $0x180] ss:$48 sps:$4 sm:$0xff]   ;;  %v3254_v19 = vld [vmem:[#allocation5 + $0x188] ss:$48 sps:$4 sm:$0xff]  }
  0x75   :  { %1355 = vmatprep.subr.bf16.mxu0 %v3237_v8  ;;  %1398 = vmatprep.subr.bf16.mxu1 %v3239_v9  ;;  %v3255_v20 = vld [vmem:[#allocation5 + $0x1e4] ss:$48 sps:$4 sm:$0xff]   ;;  %v3257_v21 = vld [vmem:[#allocation5 + $0x1ec] ss:$48 sps:$4 sm:$0xff]   ;;  %v3259_v22 = vld [vmem:[#allocation5 + $0x1e0] ss:$48 sps:$4 sm:$0xff]  }
  0x76   :  { %v3260_v23 = vld [vmem:[#allocation5 + $0x1e8] ss:$48 sps:$4 sm:$0xff]   ;;  %v3261_v24 = vld [vmem:[#allocation5 + $0x244] ss:$48 sps:$4 sm:$0xff]   ;;  %v3263_v25 = vld [vmem:[#allocation5 + $0x24c] ss:$48 sps:$4 sm:$0xff]  }
  0x77   :  { %v3265_v26 = vld [vmem:[#allocation5 + $0x240] ss:$48 sps:$4 sm:$0xff]   ;;  %v3266_v27 = vld [vmem:[#allocation5 + $0x248] ss:$48 sps:$4 sm:$0xff]   ;;  %v3267_v28 = vld [vmem:[#allocation5 + $0x2a4] ss:$48 sps:$4 sm:$0xff]  }
  0x78   :  { %1356 = vmatpush1.bf16.msra.mxu0 %v3241_v10  ;;  %1399 = vmatpush1.bf16.msra.mxu1 %v3242_v11  ;;  %v3269_v29 = vld [vmem:[#allocation5 + $0x2ac] ss:$48 sps:$4 sm:$0xff]   ;;  %v3271_v30 = vld [vmem:[#allocation5 + $0x2a0] ss:$48 sps:$4 sm:$0xff]   ;;  %v3272_v31 = vld [vmem:[#allocation5 + $0x2a8] ss:$48 sps:$4 sm:$0xff]  }
  0x79   :  { %1357 = vmatprep.subr.bf16.mxu0 %v3243_v12  ;;  %1400 = vmatprep.subr.bf16.mxu1 %v3245_v13  ;;  %v3273_v32 = vld [vmem:[#allocation5 + $0x304] ss:$48 sps:$4 sm:$0xff]   ;;  %v3275_v33 = vld [vmem:[#allocation5 + $0x30c] ss:$48 sps:$4 sm:$0xff]   ;;  %v3277_v34 = vld [vmem:[#allocation5 + $0x300] ss:$48 sps:$4 sm:$0xff]  }
  0x7a   :  { %v3278_v35 = vld [vmem:[#allocation5 + $0x308] ss:$48 sps:$4 sm:$0xff]   ;;  %v3279_v36 = vld [vmem:[#allocation5 + $0x364] ss:$48 sps:$4 sm:$0xff]   ;;  %v3281_v37 = vld [vmem:[#allocation5 + $0x36c] ss:$48 sps:$4 sm:$0xff]  }
  0x7b   :  { %v3283_v38 = vld [vmem:[#allocation5 + $0x360] ss:$48 sps:$4 sm:$0xff]   ;;  %v3284_v39 = vld [vmem:[#allocation5 + $0x368] ss:$48 sps:$4 sm:$0xff]   ;;  %v3285_v40 = vld [vmem:[#allocation5 + $0x3c4] ss:$48 sps:$4 sm:$0xff]  }
  0x7c   :  { %1358 = vmatpush1.bf16.msra.mxu0 %v3247_v14  ;;  %1401 = vmatpush1.bf16.msra.mxu1 %v3248_v15  ;;  %v3287_v41 = vld [vmem:[#allocation5 + $0x3cc] ss:$48 sps:$4 sm:$0xff]   ;;  %v3289_v42 = vld [vmem:[#allocation5 + $0x3c0] ss:$48 sps:$4 sm:$0xff]   ;;  %v3290_v43 = vld [vmem:[#allocation5 + $0x3c8] ss:$48 sps:$4 sm:$0xff]  }
  0x7d   :  { %1359 = vmatprep.subr.bf16.mxu0 %v3249_v16  ;;  %1402 = vmatprep.subr.bf16.mxu1 %v3251_v17  ;;  %v3291_v44 = vld [vmem:[#allocation5 + $0x424] ss:$48 sps:$4 sm:$0xff]   ;;  %v3293_v45 = vld [vmem:[#allocation5 + $0x42c] ss:$48 sps:$4 sm:$0xff]   ;;  %v3295_v46 = vld [vmem:[#allocation5 + $0x420] ss:$48 sps:$4 sm:$0xff]  }
  0x7e   :  { %v3296_v47 = vld [vmem:[#allocation5 + $0x428] ss:$48 sps:$4 sm:$0xff]   ;;  %v3938_v48 = vld [vmem:[#allocation2 + $0x4] ss:$8 sps:$4 sm:$0xff]   ;;  %v3301_v51 = vld [vmem:[#allocation5 + $0x480] ss:$48 sps:$4 sm:$0xff]  }
  0x7f   :  { %v3297_v49 = vld [vmem:[#allocation5 + $0x484] ss:$48 sps:$4 sm:$0xff]   ;;  %v3299_v50 = vld [vmem:[#allocation5 + $0x48c] ss:$48 sps:$4 sm:$0xff]   ;;  %1383 = vmatprep.mubr.bf16.mxu0 %v3938_v48  ;;  %1426 = vmatprep.mubr.bf16.mxu1 %v3938_v48  ;;  %v3302_v52 = vld [vmem:[#allocation5 + $0x488] ss:$48 sps:$4 sm:$0xff]  }
  0x80   :  { %1360 = vmatpush1.bf16.msra.mxu0 %v3253_v18  ;;  %1403 = vmatpush1.bf16.msra.mxu1 %v3254_v19  ;;  %v3303_v53 = vld [vmem:[#allocation5 + $0x4e4] ss:$48 sps:$4 sm:$0xff]   ;;  %v3305_v54 = vld [vmem:[#allocation5 + $0x4ec] ss:$48 sps:$4 sm:$0xff]   ;;  %v3307_v55 = vld [vmem:[#allocation5 + $0x4e0] ss:$48 sps:$4 sm:$0xff]  }
  0x81   :  { %1361 = vmatprep.subr.bf16.mxu0 %v3255_v20  ;;  %1404 = vmatprep.subr.bf16.mxu1 %v3257_v21  ;;  %v3308_v56 = vld [vmem:[#allocation5 + $0x4e8] ss:$48 sps:$4 sm:$0xff]   ;;  %v3309_v57 = vld [vmem:[#allocation5 + $0x544] ss:$48 sps:$4 sm:$0xff]   ;;  %v3311_v58 = vld [vmem:[#allocation5 + $0x54c] ss:$48 sps:$4 sm:$0xff]  }
  0x82   :  { %v3313_v59 = vld [vmem:[#allocation5 + $0x540] ss:$48 sps:$4 sm:$0xff]   ;;  %v3314_v60 = vld [vmem:[#allocation5 + $0x548] ss:$48 sps:$4 sm:$0xff]   ;;  %v3315_v61 = vld [vmem:[#allocation5 + $0x5a4] ss:$48 sps:$4 sm:$0xff]  }
  0x83   :  { %v3317_v62 = vld [vmem:[#allocation5 + $0x5ac] ss:$48 sps:$4 sm:$0xff]   ;;  %v3319_v63 = vld [vmem:[#allocation5 + $0x5a0] ss:$48 sps:$4 sm:$0xff]   ;;  %v3320_v0 = vld [vmem:[#allocation5 + $0x5a8] ss:$48 sps:$4 sm:$0xff]  }
  0x84   :  { %1362 = vmatpush1.bf16.msra.mxu0 %v3259_v22  ;;  %1405 = vmatpush1.bf16.msra.mxu1 %v3260_v23  ;;  %v3326_v1 = vld [vmem:[#allocation5 + $0x14] ss:$48 sps:$4 sm:$0xff]   ;;  %v3329_v2 = vld [vmem:[#allocation5 + $0x1c] ss:$48 sps:$4 sm:$0xff]   ;;  %v3942_v3 = vld [vmem:[#allocation2] ss:$8 sps:$4 sm:$0xff]  }
  0x85   :  { %1363 = vmatprep.subr.bf16.mxu0 %v3261_v24  ;;  %1406 = vmatprep.subr.bf16.mxu1 %v3263_v25  ;;  %v3324_v4 = vld [vmem:[#allocation5 + $0x10] ss:$48 sps:$4 sm:$0xff]   ;;  %v3327_v5 = vld [vmem:[#allocation5 + $0x18] ss:$48 sps:$4 sm:$0xff]   ;;  %v3332_v6 = vld [vmem:[#allocation5 + $0x74] ss:$48 sps:$4 sm:$0xff]  }
  0x86   :  { %v3335_v7 = vld [vmem:[#allocation5 + $0x7c] ss:$48 sps:$4 sm:$0xff]   ;;  %v3330_v8 = vld [vmem:[#allocation5 + $0x70] ss:$48 sps:$4 sm:$0xff]   ;;  %v3333_v9 = vld [vmem:[#allocation5 + $0x78] ss:$48 sps:$4 sm:$0xff]  }
  0x87   :  { %v3338_v10 = vld [vmem:[#allocation5 + $0xd4] ss:$48 sps:$4 sm:$0xff]   ;;  %v3341_v11 = vld [vmem:[#allocation5 + $0xdc] ss:$48 sps:$4 sm:$0xff]   ;;  %v3336_v12 = vld [vmem:[#allocation5 + $0xd0] ss:$48 sps:$4 sm:$0xff]  }
  0x88   :  { %1364 = vmatpush1.bf16.msra.mxu0 %v3265_v26  ;;  %1407 = vmatpush1.bf16.msra.mxu1 %v3266_v27  ;;  %v3339_v13 = vld [vmem:[#allocation5 + $0xd8] ss:$48 sps:$4 sm:$0xff]   ;;  %v3344_v14 = vld [vmem:[#allocation5 + $0x134] ss:$48 sps:$4 sm:$0xff]   ;;  %v3347_v15 = vld [vmem:[#allocation5 + $0x13c] ss:$48 sps:$4 sm:$0xff]  }
  0x89   :  { %1365 = vmatprep.subr.bf16.mxu0 %v3267_v28  ;;  %1408 = vmatprep.subr.bf16.mxu1 %v3269_v29  ;;  %v3342_v16 = vld [vmem:[#allocation5 + $0x130] ss:$48 sps:$4 sm:$0xff]   ;;  %v3345_v17 = vld [vmem:[#allocation5 + $0x138] ss:$48 sps:$4 sm:$0xff]   ;;  %v3350_v18 = vld [vmem:[#allocation5 + $0x194] ss:$48 sps:$4 sm:$0xff]  }
  0x8a   :  { %v3353_v19 = vld [vmem:[#allocation5 + $0x19c] ss:$48 sps:$4 sm:$0xff]   ;;  %v3348_v20 = vld [vmem:[#allocation5 + $0x190] ss:$48 sps:$4 sm:$0xff]   ;;  %v3351_v21 = vld [vmem:[#allocation5 + $0x198] ss:$48 sps:$4 sm:$0xff]  }
  0x8b   :  { %v3356_v22 = vld [vmem:[#allocation5 + $0x1f4] ss:$48 sps:$4 sm:$0xff]   ;;  %v3359_v23 = vld [vmem:[#allocation5 + $0x1fc] ss:$48 sps:$4 sm:$0xff]   ;;  %v3354_v24 = vld [vmem:[#allocation5 + $0x1f0] ss:$48 sps:$4 sm:$0xff]  }
  0x8c   :  { %1366 = vmatpush1.bf16.msra.mxu0 %v3271_v30  ;;  %1409 = vmatpush1.bf16.msra.mxu1 %v3272_v31  ;;  %v3357_v25 = vld [vmem:[#allocation5 + $0x1f8] ss:$48 sps:$4 sm:$0xff]   ;;  %v3362_v26 = vld [vmem:[#allocation5 + $0x254] ss:$48 sps:$4 sm:$0xff]   ;;  %v3365_v27 = vld [vmem:[#allocation5 + $0x25c] ss:$48 sps:$4 sm:$0xff]  }
  0x8d   :  { %1367 = vmatprep.subr.bf16.mxu0 %v3273_v32  ;;  %1410 = vmatprep.subr.bf16.mxu1 %v3275_v33  ;;  %v3360_v28 = vld [vmem:[#allocation5 + $0x250] ss:$48 sps:$4 sm:$0xff]   ;;  %v3363_v29 = vld [vmem:[#allocation5 + $0x258] ss:$48 sps:$4 sm:$0xff]   ;;  %v3368_v30 = vld [vmem:[#allocation5 + $0x2b4] ss:$48 sps:$4 sm:$0xff]  }
  0x8e   :  { %v3371_v31 = vld [vmem:[#allocation5 + $0x2bc] ss:$48 sps:$4 sm:$0xff]   ;;  %v3366_v32 = vld [vmem:[#allocation5 + $0x2b0] ss:$48 sps:$4 sm:$0xff]   ;;  %v3369_v33 = vld [vmem:[#allocation5 + $0x2b8] ss:$48 sps:$4 sm:$0xff]  }
  0x8f   :  { %vm3788_vm0 = vmmov 0   ;;  %vm2645_vm1 = vcmask 261120   ;;  %s3790_s15 = smov [#allocation13]  }
  0x90   :  { %1368 = vmatpush1.bf16.msra.mxu0 %v3277_v34  ;;  %1411 = vmatpush1.bf16.msra.mxu1 %v3278_v35  ;;  %v3374_v34 = vld [vmem:[#allocation5 + $0x314] ss:$48 sps:$4 sm:$0xff]   ;;  %v3377_v35 = vld [vmem:[#allocation5 + $0x31c] ss:$48 sps:$4 sm:$0xff]   ;;  %s2812_s16 = sshll.u32 %s3790_s15, 4  ;;  %s2813_s16 = int_to_ptr.vmem [resolvable:$true] %s2812_s16 }
  0x91   :  { %1369 = vmatprep.subr.bf16.mxu0 %v3279_v36  ;;  %1412 = vmatprep.subr.bf16.mxu1 %v3281_v37  ;;  %v3372_v36 = vld [vmem:[#allocation5 + $0x310] ss:$48 sps:$4 sm:$0xff]   ;;  %v3375_v37 = vld [vmem:[#allocation5 + $0x318] ss:$48 sps:$4 sm:$0xff]   ;;  %p3747_p7 = scmp.lt.s32.totalorder %s2813_s16, %s2813_s16 }
  0x94   :  { %1370 = vmatpush1.bf16.msra.mxu0 %v3283_v38  ;;  %1413 = vmatpush1.bf16.msra.mxu1 %v3284_v39  ;;  %v3380_v38 = vld [vmem:[#allocation5 + $0x374] ss:$48 sps:$4 sm:$0xff]   ;;  %v3383_v39 = vld [vmem:[#allocation5 + $0x37c] ss:$48 sps:$4 sm:$0xff]  }
  0x95   :  { %1371 = vmatprep.subr.bf16.mxu0 %v3285_v40  ;;  %1414 = vmatprep.subr.bf16.mxu1 %v3287_v41  ;;  %v3378_v40 = vld [vmem:[#allocation5 + $0x370] ss:$48 sps:$4 sm:$0xff]   ;;  %v3381_v41 = vld [vmem:[#allocation5 + $0x378] ss:$48 sps:$4 sm:$0xff]  }
  0x98   :  { %1372 = vmatpush1.bf16.msra.mxu0 %v3289_v42  ;;  %1415 = vmatpush1.bf16.msra.mxu1 %v3290_v43  ;;  %v3386_v42 = vld [vmem:[#allocation5 + $0x3d4] ss:$48 sps:$4 sm:$0xff]   ;;  %v3389_v43 = vld [vmem:[#allocation5 + $0x3dc] ss:$48 sps:$4 sm:$0xff]  }
  0x99   :  { %1373 = vmatprep.subr.bf16.mxu0 %v3291_v44  ;;  %1416 = vmatprep.subr.bf16.mxu1 %v3293_v45  ;;  %v3384_v44 = vld [vmem:[#allocation5 + $0x3d0] ss:$48 sps:$4 sm:$0xff]   ;;  %v3387_v45 = vld [vmem:[#allocation5 + $0x3d8] ss:$48 sps:$4 sm:$0xff]  }
  0x9c   :  { %1374 = vmatpush1.bf16.msra.mxu0 %v3295_v46  ;;  %1417 = vmatpush1.bf16.msra.mxu1 %v3296_v47  ;;  %v3392_v46 = vld [vmem:[#allocation5 + $0x434] ss:$48 sps:$4 sm:$0xff]   ;;  %v3395_v47 = vld [vmem:[#allocation5 + $0x43c] ss:$48 sps:$4 sm:$0xff]  }
  0x9d   :  { %1375 = vmatprep.subr.bf16.mxu0 %v3297_v49  ;;  %1418 = vmatprep.subr.bf16.mxu1 %v3299_v50  ;;  %v3390_v49 = vld [vmem:[#allocation5 + $0x430] ss:$48 sps:$4 sm:$0xff]   ;;  %v3393_v50 = vld [vmem:[#allocation5 + $0x438] ss:$48 sps:$4 sm:$0xff]  }
  0xa0   :  { %1376 = vmatpush1.bf16.msra.mxu0 %v3301_v51  ;;  %1419 = vmatpush1.bf16.msra.mxu1 %v3302_v52  ;;  %v3398_v51 = vld [vmem:[#allocation5 + $0x494] ss:$48 sps:$4 sm:$0xff]   ;;  %v3401_v52 = vld [vmem:[#allocation5 + $0x49c] ss:$48 sps:$4 sm:$0xff]  }
  0xa1   :  { %1377 = vmatprep.subr.bf16.mxu0 %v3303_v53  ;;  %1420 = vmatprep.subr.bf16.mxu1 %v3305_v54  ;;  %v3396_v53 = vld [vmem:[#allocation5 + $0x490] ss:$48 sps:$4 sm:$0xff]   ;;  %v3399_v54 = vld [vmem:[#allocation5 + $0x498] ss:$48 sps:$4 sm:$0xff]  }
  0xa4   :  { %1378 = vmatpush1.bf16.msra.mxu0 %v3307_v55  ;;  %1421 = vmatpush1.bf16.msra.mxu1 %v3308_v56  ;;  %v3404_v55 = vld [vmem:[#allocation5 + $0x4f4] ss:$48 sps:$4 sm:$0xff]   ;;  %v3407_v56 = vld [vmem:[#allocation5 + $0x4fc] ss:$48 sps:$4 sm:$0xff]  }
  0xa5   :  { %1379 = vmatprep.subr.bf16.mxu0 %v3309_v57  ;;  %1422 = vmatprep.subr.bf16.mxu1 %v3311_v58  ;;  %v3402_v57 = vld [vmem:[#allocation5 + $0x4f0] ss:$48 sps:$4 sm:$0xff]   ;;  %v3405_v58 = vld [vmem:[#allocation5 + $0x4f8] ss:$48 sps:$4 sm:$0xff]  }
  0xa8   :  { %1380 = vmatpush1.bf16.msra.mxu0 %v3313_v59  ;;  %1423 = vmatpush1.bf16.msra.mxu1 %v3314_v60  ;;  %v3410_v59 = vld [vmem:[#allocation5 + $0x554] ss:$48 sps:$4 sm:$0xff]   ;;  %v3413_v60 = vld [vmem:[#allocation5 + $0x55c] ss:$48 sps:$4 sm:$0xff]  }
  0xa9   :  { %1381 = vmatprep.subr.bf16.mxu0 %v3315_v61  ;;  %1424 = vmatprep.subr.bf16.mxu1 %v3317_v62  ;;  %v3408_v61 = vld [vmem:[#allocation5 + $0x550] ss:$48 sps:$4 sm:$0xff]   ;;  %v3411_v62 = vld [vmem:[#allocation5 + $0x558] ss:$48 sps:$4 sm:$0xff]  }
  0xac   :  { %1382 = vmatpush1.bf16.msra.mxu0 %v3319_v63  ;;  %1425 = vmatpush1.bf16.msra.mxu1 %v3320_v0  ;;  %v3416_v63 = vld [vmem:[#allocation5 + $0x5b4] ss:$48 sps:$4 sm:$0xff]   ;;  %v3419_v0 = vld [vmem:[#allocation5 + $0x5bc] ss:$48 sps:$4 sm:$0xff]  }
  0xad   :  { %1437 = vmatprep.subr.bf16.mxu0 %v3326_v1  ;;  %1480 = vmatprep.subr.bf16.mxu1 %v3329_v2  ;;  %v3414_v1 = vld [vmem:[#allocation5 + $0x5b0] ss:$48 sps:$4 sm:$0xff]   ;;  %v3417_v2 = vld [vmem:[#allocation5 + $0x5b8] ss:$48 sps:$4 sm:$0xff]  }
  0xaf   :  { %1384 = vmatmul.mubr.bf16.vlgmr.msra.gmra.mrb[0].mxu0 %v3942_v3  ;;  %1427 = vmatmul.mubr.bf16.vlgmr.msra.gmra.mrb[0].mxu1 %v3942_v3 }
  0xb0   :  { %1438 = vmatpush1.bf16.msra.mxu0 %v3324_v4  ;;  %1481 = vmatpush1.bf16.msra.mxu1 %v3327_v5  ;;  %v3422_v4 = vld [vmem:[#allocation5 + $0x24] ss:$48 sps:$4 sm:$0xff]   ;;  %v3425_v5 = vld [vmem:[#allocation5 + $0x2c] ss:$48 sps:$4 sm:$0xff]  }
  0xb1   :  { %1439 = vmatprep.subr.bf16.mxu0 %v3332_v6  ;;  %1482 = vmatprep.subr.bf16.mxu1 %v3335_v7  ;;  %v3420_v6 = vld [vmem:[#allocation5 + $0x20] ss:$48 sps:$4 sm:$0xff]   ;;  %v3423_v7 = vld [vmem:[#allocation5 + $0x28] ss:$48 sps:$4 sm:$0xff]  }
  0xb2   :  { %1469 = vmatprep.mubr.bf16.mxu0 %v3938_v48  ;;  %1512 = vmatprep.mubr.bf16.mxu1 %v3938_v48 }
  0xb4   :  { %1440 = vmatpush1.bf16.msra.mxu0 %v3330_v8  ;;  %1483 = vmatpush1.bf16.msra.mxu1 %v3333_v9  ;;  %v3428_v8 = vld [vmem:[#allocation5 + $0x84] ss:$48 sps:$4 sm:$0xff]   ;;  %v3431_v9 = vld [vmem:[#allocation5 + $0x8c] ss:$48 sps:$4 sm:$0xff]  }
  0xb5   :  { %1441 = vmatprep.subr.bf16.mxu0 %v3338_v10  ;;  %1484 = vmatprep.subr.bf16.mxu1 %v3341_v11  ;;  %v3426_v10 = vld [vmem:[#allocation5 + $0x80] ss:$48 sps:$4 sm:$0xff]   ;;  %v3429_v11 = vld [vmem:[#allocation5 + $0x88] ss:$48 sps:$4 sm:$0xff]  }
  0xb8   :  { %1442 = vmatpush1.bf16.msra.mxu0 %v3336_v12  ;;  %1485 = vmatpush1.bf16.msra.mxu1 %v3339_v13  ;;  %v3434_v12 = vld [vmem:[#allocation5 + $0xe4] ss:$48 sps:$4 sm:$0xff]   ;;  %v3437_v13 = vld [vmem:[#allocation5 + $0xec] ss:$48 sps:$4 sm:$0xff]  }
  0xb9   :  { %1443 = vmatprep.subr.bf16.mxu0 %v3344_v14  ;;  %1486 = vmatprep.subr.bf16.mxu1 %v3347_v15  ;;  %v3432_v14 = vld [vmem:[#allocation5 + $0xe0] ss:$48 sps:$4 sm:$0xff]   ;;  %v3435_v15 = vld [vmem:[#allocation5 + $0xe8] ss:$48 sps:$4 sm:$0xff]  }
  0xbc   :  { %1444 = vmatpush1.bf16.msra.mxu0 %v3342_v16  ;;  %1487 = vmatpush1.bf16.msra.mxu1 %v3345_v17  ;;  %v3440_v16 = vld [vmem:[#allocation5 + $0x144] ss:$48 sps:$4 sm:$0xff]   ;;  %v3443_v17 = vld [vmem:[#allocation5 + $0x14c] ss:$48 sps:$4 sm:$0xff]  }
  0xbd   :  { %1445 = vmatprep.subr.bf16.mxu0 %v3350_v18  ;;  %1488 = vmatprep.subr.bf16.mxu1 %v3353_v19  ;;  %v3438_v18 = vld [vmem:[#allocation5 + $0x140] ss:$48 sps:$4 sm:$0xff]   ;;  %v3441_v19 = vld [vmem:[#allocation5 + $0x148] ss:$48 sps:$4 sm:$0xff]  }
  0xc0   :  { %1446 = vmatpush1.bf16.msra.mxu0 %v3348_v20  ;;  %1489 = vmatpush1.bf16.msra.mxu1 %v3351_v21  ;;  %v3446_v20 = vld [vmem:[#allocation5 + $0x1a4] ss:$48 sps:$4 sm:$0xff]   ;;  %v3449_v21 = vld [vmem:[#allocation5 + $0x1ac] ss:$48 sps:$4 sm:$0xff]  }
  0xc1   :  { %1447 = vmatprep.subr.bf16.mxu0 %v3356_v22  ;;  %1490 = vmatprep.subr.bf16.mxu1 %v3359_v23  ;;  %v3444_v22 = vld [vmem:[#allocation5 + $0x1a0] ss:$48 sps:$4 sm:$0xff]   ;;  %v3447_v23 = vld [vmem:[#allocation5 + $0x1a8] ss:$48 sps:$4 sm:$0xff]  }
  0xc4   :  { %1448 = vmatpush1.bf16.msra.mxu0 %v3354_v24  ;;  %1491 = vmatpush1.bf16.msra.mxu1 %v3357_v25  ;;  %v3452_v24 = vld [vmem:[#allocation5 + $0x204] ss:$48 sps:$4 sm:$0xff]   ;;  %v3455_v25 = vld [vmem:[#allocation5 + $0x20c] ss:$48 sps:$4 sm:$0xff]  }
  0xc5   :  { %1449 = vmatprep.subr.bf16.mxu0 %v3362_v26  ;;  %1492 = vmatprep.subr.bf16.mxu1 %v3365_v27  ;;  %v3453_v26 = vld [vmem:[#allocation5 + $0x208] ss:$48 sps:$4 sm:$0xff]   ;;  %v3458_v27 = vld [vmem:[#allocation5 + $0x264] ss:$48 sps:$4 sm:$0xff]  }
  0xc8   :  { %1450 = vmatpush1.bf16.msra.mxu0 %v3360_v28  ;;  %1493 = vmatpush1.bf16.msra.mxu1 %v3363_v29  ;;  %v3461_v28 = vld [vmem:[#allocation5 + $0x26c] ss:$48 sps:$4 sm:$0xff]   ;;  %v3456_v29 = vld [vmem:[#allocation5 + $0x260] ss:$48 sps:$4 sm:$0xff]  }
  0xc9   :  { %1451 = vmatprep.subr.bf16.mxu0 %v3368_v30  ;;  %1494 = vmatprep.subr.bf16.mxu1 %v3371_v31  ;;  %v3459_v30 = vld [vmem:[#allocation5 + $0x268] ss:$48 sps:$4 sm:$0xff]   ;;  %v3464_v31 = vld [vmem:[#allocation5 + $0x2c4] ss:$48 sps:$4 sm:$0xff]  }
  0xcc   :  { %1452 = vmatpush1.bf16.msra.mxu0 %v3366_v32  ;;  %1495 = vmatpush1.bf16.msra.mxu1 %v3369_v33  ;;  %v3467_v32 = vld [vmem:[#allocation5 + $0x2cc] ss:$48 sps:$4 sm:$0xff]   ;;  %v3462_v33 = vld [vmem:[#allocation5 + $0x2c0] ss:$48 sps:$4 sm:$0xff]  }
  0xcd   :  { %1453 = vmatprep.subr.bf16.mxu0 %v3374_v34  ;;  %1496 = vmatprep.subr.bf16.mxu1 %v3377_v35  ;;  %v3465_v34 = vld [vmem:[#allocation5 + $0x2c8] ss:$48 sps:$4 sm:$0xff]   ;;  %v3470_v35 = vld [vmem:[#allocation5 + $0x324] ss:$48 sps:$4 sm:$0xff]  }
  0xd0   :  { %1454 = vmatpush1.bf16.msra.mxu0 %v3372_v36  ;;  %1497 = vmatpush1.bf16.msra.mxu1 %v3375_v37  ;;  %v3473_v36 = vld [vmem:[#allocation5 + $0x32c] ss:$48 sps:$4 sm:$0xff]   ;;  %v3468_v37 = vld [vmem:[#allocation5 + $0x320] ss:$48 sps:$4 sm:$0xff]  }
  0xd1   :  { %1455 = vmatprep.subr.bf16.mxu0 %v3380_v38  ;;  %1498 = vmatprep.subr.bf16.mxu1 %v3383_v39  ;;  %v3471_v38 = vld [vmem:[#allocation5 + $0x328] ss:$48 sps:$4 sm:$0xff]   ;;  %v3476_v39 = vld [vmem:[#allocation5 + $0x384] ss:$48 sps:$4 sm:$0xff]  }
  0xd4   :  { %1456 = vmatpush1.bf16.msra.mxu0 %v3378_v40  ;;  %1499 = vmatpush1.bf16.msra.mxu1 %v3381_v41  ;;  %v3479_v40 = vld [vmem:[#allocation5 + $0x38c] ss:$48 sps:$4 sm:$0xff]   ;;  %v3474_v41 = vld [vmem:[#allocation5 + $0x380] ss:$48 sps:$4 sm:$0xff]  }
  0xd5   :  { %1457 = vmatprep.subr.bf16.mxu0 %v3386_v42  ;;  %1500 = vmatprep.subr.bf16.mxu1 %v3389_v43  ;;  %v3477_v42 = vld [vmem:[#allocation5 + $0x388] ss:$48 sps:$4 sm:$0xff]   ;;  %v3482_v43 = vld [vmem:[#allocation5 + $0x3e4] ss:$48 sps:$4 sm:$0xff]  }
  0xd8   :  { %1458 = vmatpush1.bf16.msra.mxu0 %v3384_v44  ;;  %1501 = vmatpush1.bf16.msra.mxu1 %v3387_v45  ;;  %v3485_v44 = vld [vmem:[#allocation5 + $0x3ec] ss:$48 sps:$4 sm:$0xff]   ;;  %v3480_v45 = vld [vmem:[#allocation5 + $0x3e0] ss:$48 sps:$4 sm:$0xff]  }
  0xd9   :  { %1459 = vmatprep.subr.bf16.mxu0 %v3392_v46  ;;  %1502 = vmatprep.subr.bf16.mxu1 %v3395_v47  ;;  %v3483_v46 = vld [vmem:[#allocation5 + $0x3e8] ss:$48 sps:$4 sm:$0xff]   ;;  %v3488_v47 = vld [vmem:[#allocation5 + $0x444] ss:$48 sps:$4 sm:$0xff]  }
  0xdc   :  { %1460 = vmatpush1.bf16.msra.mxu0 %v3390_v49  ;;  %1503 = vmatpush1.bf16.msra.mxu1 %v3393_v50  ;;  %v3491_v49 = vld [vmem:[#allocation5 + $0x44c] ss:$48 sps:$4 sm:$0xff]   ;;  %v3486_v50 = vld [vmem:[#allocation5 + $0x440] ss:$48 sps:$4 sm:$0xff]  }
  0xdd   :  { %1461 = vmatprep.subr.bf16.mxu0 %v3398_v51  ;;  %1504 = vmatprep.subr.bf16.mxu1 %v3401_v52  ;;  %v3489_v51 = vld [vmem:[#allocation5 + $0x448] ss:$48 sps:$4 sm:$0xff]   ;;  %v3494_v52 = vld [vmem:[#allocation5 + $0x4a4] ss:$48 sps:$4 sm:$0xff]  }
  0xe0   :  { %1462 = vmatpush1.bf16.msra.mxu0 %v3396_v53  ;;  %1505 = vmatpush1.bf16.msra.mxu1 %v3399_v54  ;;  %v3497_v53 = vld [vmem:[#allocation5 + $0x4ac] ss:$48 sps:$4 sm:$0xff]   ;;  %v3492_v54 = vld [vmem:[#allocation5 + $0x4a0] ss:$48 sps:$4 sm:$0xff]  }
  0xe1   :  { %1463 = vmatprep.subr.bf16.mxu0 %v3404_v55  ;;  %1506 = vmatprep.subr.bf16.mxu1 %v3407_v56  ;;  %v3495_v55 = vld [vmem:[#allocation5 + $0x4a8] ss:$48 sps:$4 sm:$0xff]   ;;  %v3500_v56 = vld [vmem:[#allocation5 + $0x504] ss:$48 sps:$4 sm:$0xff]  }
  0xe4   :  { %1464 = vmatpush1.bf16.msra.mxu0 %v3402_v57  ;;  %1507 = vmatpush1.bf16.msra.mxu1 %v3405_v58  ;;  %v3503_v57 = vld [vmem:[#allocation5 + $0x50c] ss:$48 sps:$4 sm:$0xff]   ;;  %v3498_v58 = vld [vmem:[#allocation5 + $0x500] ss:$48 sps:$4 sm:$0xff]  }
  0xe5   :  { %1465 = vmatprep.subr.bf16.mxu0 %v3410_v59  ;;  %1508 = vmatprep.subr.bf16.mxu1 %v3413_v60  ;;  %v3501_v59 = vld [vmem:[#allocation5 + $0x508] ss:$48 sps:$4 sm:$0xff]   ;;  %v3506_v60 = vld [vmem:[#allocation5 + $0x564] ss:$48 sps:$4 sm:$0xff]  }
  0xe8   :  { %1466 = vmatpush1.bf16.msra.mxu0 %v3408_v61  ;;  %1509 = vmatpush1.bf16.msra.mxu1 %v3411_v62  ;;  %v3509_v61 = vld [vmem:[#allocation5 + $0x56c] ss:$48 sps:$4 sm:$0xff]   ;;  %v3504_v62 = vld [vmem:[#allocation5 + $0x560] ss:$48 sps:$4 sm:$0xff]  }
  0xe9   :  { %1467 = vmatprep.subr.bf16.mxu0 %v3416_v63  ;;  %1510 = vmatprep.subr.bf16.mxu1 %v3419_v0  ;;  %v3507_v63 = vld [vmem:[#allocation5 + $0x568] ss:$48 sps:$4 sm:$0xff]   ;;  %v3512_v0 = vld [vmem:[#allocation5 + $0x5c4] ss:$48 sps:$4 sm:$0xff]  }
  0xec   :  { %1468 = vmatpush1.bf16.msra.mxu0 %v3414_v1  ;;  %1511 = vmatpush1.bf16.msra.mxu1 %v3417_v2  ;;  %v3515_v1 = vld [vmem:[#allocation5 + $0x5cc] ss:$48 sps:$4 sm:$0xff]   ;;  %v3510_v2 = vld [vmem:[#allocation5 + $0x5c0] ss:$48 sps:$4 sm:$0xff]  }
  0xed   :  { %1523 = vmatprep.subr.bf16.mxu0 %v3422_v4  ;;  %1566 = vmatprep.subr.bf16.mxu1 %v3425_v5  ;;  %v3513_v4 = vld [vmem:[#allocation5 + $0x5c8] ss:$48 sps:$4 sm:$0xff]  }
  0xee   :  { %v3952_v5 = vld [vmem:[#allocation8 + $0x4] ss:$8 sps:$4 sm:$0xff]  }
  0xef   :  { %1470 = vmatmul.mubr.bf16.vlgmr.msra.gmra.mrb[4].mxu0 %v3942_v3  ;;  %1513 = vmatmul.mubr.bf16.vlgmr.msra.gmra.mrb[4].mxu1 %v3942_v3 }
  0xf0   :  { %1524 = vmatpush1.bf16.msra.mxu0 %v3420_v6  ;;  %1567 = vmatpush1.bf16.msra.mxu1 %v3423_v7  ;;  %v3954_v6 = vld [vmem:[#allocation8] ss:$8 sps:$4 sm:$0xff]   ;;  %v3958_v7 = vld [vmem:[#allocation8 + $0x14] ss:$8 sps:$4 sm:$0xff]  }
  0xf1   :  { %1525 = vmatprep.subr.bf16.mxu0 %v3428_v8  ;;  %1568 = vmatprep.subr.bf16.mxu1 %v3431_v9  ;;  %v3964_v8 = vld [vmem:[#allocation8 + $0x10] ss:$8 sps:$4 sm:$0xff]   ;;  %v3968_v9 = vld [vmem:[#allocation8 + $0x24] ss:$8 sps:$4 sm:$0xff]  }
  0xf2   :  { %1555 = vmatprep.mubr.bf16.mxu0 %v3938_v48  ;;  %1598 = vmatprep.mubr.bf16.mxu1 %v3938_v48  ;;  %v3450_v48 = vld [vmem:[#allocation5 + $0x200] ss:$48 sps:$4 sm:$0xff]  }
  0xf4   :  { %1526 = vmatpush1.bf16.msra.mxu0 %v3426_v10  ;;  %1569 = vmatpush1.bf16.msra.mxu1 %v3429_v11  ;;  %v3972_v10 = vld [vmem:[#allocation8 + $0x20] ss:$8 sps:$4 sm:$0xff]   ;;  %v3980_v11 = vld [vmem:[#allocation8 + $0x30] ss:$8 sps:$4 sm:$0xff]  }
  0xf5   :  { %1527 = vmatprep.subr.bf16.mxu0 %v3434_v12  ;;  %1570 = vmatprep.subr.bf16.mxu1 %v3437_v13  ;;  %v3984_v12 = vld [vmem:[#allocation8 + $0x44] ss:$8 sps:$4 sm:$0xff]   ;;  %v3988_v13 = vld [vmem:[#allocation8 + $0x40] ss:$8 sps:$4 sm:$0xff]  }
  0xf8   :  { %1528 = vmatpush1.bf16.msra.mxu0 %v3432_v14  ;;  %1571 = vmatpush1.bf16.msra.mxu1 %v3435_v15  ;;  %v3992_v14 = vld [vmem:[#allocation8 + $0x54] ss:$8 sps:$4 sm:$0xff]   ;;  %v3996_v15 = vld [vmem:[#allocation8 + $0x50] ss:$8 sps:$4 sm:$0xff]  }
  0xf9   :  { %1529 = vmatprep.subr.bf16.mxu0 %v3440_v16  ;;  %1572 = vmatprep.subr.bf16.mxu1 %v3443_v17  ;;  %v4000_v16 = vld [vmem:[#allocation8 + $0x64] ss:$8 sps:$4 sm:$0xff]   ;;  %v4004_v17 = vld [vmem:[#allocation8 + $0x60] ss:$8 sps:$4 sm:$0xff]  }
  0xfc   :  { %1530 = vmatpush1.bf16.msra.mxu0 %v3438_v18  ;;  %1573 = vmatpush1.bf16.msra.mxu1 %v3441_v19  ;;  %v4008_v18 = vld [vmem:[#allocation8 + $0x74] ss:$8 sps:$4 sm:$0xff]   ;;  %v4012_v19 = vld [vmem:[#allocation8 + $0x70] ss:$8 sps:$4 sm:$0xff]  }
  0xfd   :  { %1531 = vmatprep.subr.bf16.mxu0 %v3446_v20  ;;  %1574 = vmatprep.subr.bf16.mxu1 %v3449_v21  ;;  %v3786_v20 = vmov 0  }
 0x100   :  { %1532 = vmatpush1.bf16.msra.mxu0 %v3444_v22  ;;  %1575 = vmatpush1.bf16.msra.mxu1 %v3447_v23 }
 0x101   :  { %1533 = vmatprep.subr.bf16.mxu0 %v3452_v24  ;;  %1576 = vmatprep.subr.bf16.mxu1 %v3455_v25 }
 0x104   :  { %1534 = vmatpush1.bf16.msra.mxu0 %v3450_v48  ;;  %1577 = vmatpush1.bf16.msra.mxu1 %v3453_v26 }
 0x105   :  { %1535 = vmatprep.subr.bf16.mxu0 %v3458_v27  ;;  %1578 = vmatprep.subr.bf16.mxu1 %v3461_v28  ;;  %v321_v28 = vlaneseq }
 0x108   :  { %1536 = vmatpush1.bf16.msra.mxu0 %v3456_v29  ;;  %1579 = vmatpush1.bf16.msra.mxu1 %v3459_v30  ;;  %v4030_v29 = vshrl.u32 %v321_v28, 7 }
 0x109   :  { %1537 = vmatprep.subr.bf16.mxu0 %v3464_v31  ;;  %1580 = vmatprep.subr.bf16.mxu1 %v3467_v32  ;;  %v4035_v31 = vld [vmem:[#allocation7] sm:$0xff] }
 0x10a   :  { %v4033_v30 = vsub.s32 0, %v4030_v29  ;;  %v4038_v32 = vsub.s32 1, %v4030_v29  ;;  %v339_v28 = vsub.s32 4, %v4030_v29 }
 0x10c   :  { %1538 = vmatpush1.bf16.msra.mxu0 %v3462_v33  ;;  %1581 = vmatpush1.bf16.msra.mxu1 %v3465_v34  ;;  %v347_v33 = vsub.s32 6, %v4030_v29  ;;  %v351_v34 = vsub.s32 7, %v4030_v29 }
 0x10d   :  { %1539 = vmatprep.subr.bf16.mxu0 %v3470_v35  ;;  %1582 = vmatprep.subr.bf16.mxu1 %v3473_v36  ;;  %v324_v35 = vrot.slane %v4035_v31, %v4033_v30  ;;  %v328_v36 = vrot.slane %v4035_v31, %v4038_v32 }
 0x110   :  { %1540 = vmatpush1.bf16.msra.mxu0 %v3468_v37  ;;  %1583 = vmatpush1.bf16.msra.mxu1 %v3471_v38  ;;  %v348_v37 = vrot.slane %v4035_v31, %v347_v33  ;;  %v352_v38 = vrot.slane %v4035_v31, %v351_v34  ;;  %v343_v33 = vsub.s32 5, %v4030_v29 }
 0x111   :  { %1541 = vmatprep.subr.bf16.mxu0 %v3476_v39  ;;  %1584 = vmatprep.subr.bf16.mxu1 %v3479_v40 }
 0x114   :  { %1542 = vmatpush1.bf16.msra.mxu0 %v3474_v41  ;;  %1585 = vmatpush1.bf16.msra.mxu1 %v3477_v42 }
 0x115   :  { %1543 = vmatprep.subr.bf16.mxu0 %v3482_v43  ;;  %1586 = vmatprep.subr.bf16.mxu1 %v3485_v44 }
 0x118   :  { %1544 = vmatpush1.bf16.msra.mxu0 %v3480_v45  ;;  %1587 = vmatpush1.bf16.msra.mxu1 %v3483_v46 }
 0x119   :  { %1545 = vmatprep.subr.bf16.mxu0 %v3488_v47  ;;  %1588 = vmatprep.subr.bf16.mxu1 %v3491_v49 }
 0x11c   :  { %1546 = vmatpush1.bf16.msra.mxu0 %v3486_v50  ;;  %1589 = vmatpush1.bf16.msra.mxu1 %v3489_v51 }
 0x11d   :  { %1547 = vmatprep.subr.bf16.mxu0 %v3494_v52  ;;  %1590 = vmatprep.subr.bf16.mxu1 %v3497_v53 }
 0x120   :  { %1548 = vmatpush1.bf16.msra.mxu0 %v3492_v54  ;;  %1591 = vmatpush1.bf16.msra.mxu1 %v3495_v55 }
 0x121   :  { %1549 = vmatprep.subr.bf16.mxu0 %v3500_v56  ;;  %1592 = vmatprep.subr.bf16.mxu1 %v3503_v57 }
 0x124   :  { %1550 = vmatpush1.bf16.msra.mxu0 %v3498_v58  ;;  %1593 = vmatpush1.bf16.msra.mxu1 %v3501_v59 }
 0x125   :  { %1551 = vmatprep.subr.bf16.mxu0 %v3506_v60  ;;  %1594 = vmatprep.subr.bf16.mxu1 %v3509_v61 }
 0x128   :  { %1552 = vmatpush1.bf16.msra.mxu0 %v3504_v62  ;;  %1595 = vmatpush1.bf16.msra.mxu1 %v3507_v63 }
 0x129   :  { %1553 = vmatprep.subr.bf16.mxu0 %v3512_v0  ;;  %1596 = vmatprep.subr.bf16.mxu1 %v3515_v1 }
 0x12c   :  { %1554 = vmatpush1.bf16.msra.mxu0 %v3510_v2  ;;  %1597 = vmatpush1.bf16.msra.mxu1 %v3513_v4 }
 0x12d   :  { %1759 = vmatprep.subr.bf16.mxu0 %v3952_v5  ;;  %1808 = vmatprep.subr.bf16.mxu1 %v3952_v5 }
 0x12f   :  { %1556 = vmatmul.mubr.bf16.vlgmr.msra.gmra.mrb[8].mxu0 %v3942_v3  ;;  %1599 = vmatmul.mubr.bf16.vlgmr.msra.gmra.mrb[8].mxu1 %v3942_v3  ;;  %v3976_v3 = vld [vmem:[#allocation8 + $0x34] ss:$8 sps:$4 sm:$0xff]  }
 0x130   :  { %1760 = vmatpush1.bf16.msra.mxu0 %v3954_v6  ;;  %1809 = vmatpush1.bf16.msra.mxu1 %v3954_v6 }
 0x131   :  { %1761 = vmatprep.subr.bf16.mxu0 %v3958_v7  ;;  %1810 = vmatprep.subr.bf16.mxu1 %v3958_v7 }
 0x132   :  { %1791 = vmatprep.mubr.bf16.mxu0 %v3786_v20  ;;  %1840 = vmatprep.mubr.bf16.mxu1 %v3786_v20 }
 0x134   :  { %1762 = vmatpush1.bf16.msra.mxu0 %v3964_v8  ;;  %1811 = vmatpush1.bf16.msra.mxu1 %v3964_v8 }
 0x135   :  { %1763 = vmatprep.subr.bf16.mxu0 %v3968_v9  ;;  %1812 = vmatprep.subr.bf16.mxu1 %v3968_v9 }
 0x138   :  { %1764 = vmatpush1.bf16.msra.mxu0 %v3972_v10  ;;  %1813 = vmatpush1.bf16.msra.mxu1 %v3972_v10 }
 0x139   :  { %1765 = vmatprep.subr.bf16.mxu0 %v3976_v3  ;;  %1814 = vmatprep.subr.bf16.mxu1 %v3976_v3 }
 0x13c   :  { %1766 = vmatpush1.bf16.msra.mxu0 %v3980_v11  ;;  %1815 = vmatpush1.bf16.msra.mxu1 %v3980_v11 }
 0x13d   :  { %1767 = vmatprep.subr.bf16.mxu0 %v3984_v12  ;;  %1816 = vmatprep.subr.bf16.mxu1 %v3984_v12 }
 0x140   :  { %1768 = vmatpush1.bf16.msra.mxu0 %v3988_v13  ;;  %1817 = vmatpush1.bf16.msra.mxu1 %v3988_v13 }
 0x141   :  { %1769 = vmatprep.subr.bf16.mxu0 %v3992_v14  ;;  %1818 = vmatprep.subr.bf16.mxu1 %v3992_v14 }
 0x144   :  { %1770 = vmatpush1.bf16.msra.mxu0 %v3996_v15  ;;  %1819 = vmatpush1.bf16.msra.mxu1 %v3996_v15 }
 0x145   :  { %1771 = vmatprep.subr.bf16.mxu0 %v4000_v16  ;;  %1820 = vmatprep.subr.bf16.mxu1 %v4000_v16 }
 0x148   :  { %1772 = vmatpush1.bf16.msra.mxu0 %v4004_v17  ;;  %1821 = vmatpush1.bf16.msra.mxu1 %v4004_v17 }
 0x149   :  { %1773 = vmatprep.subr.bf16.mxu0 %v4008_v18  ;;  %1822 = vmatprep.subr.bf16.mxu1 %v4008_v18 }
 0x14c   :  { %1774 = vmatpush1.bf16.msra.mxu0 %v4012_v19  ;;  %1823 = vmatpush1.bf16.msra.mxu1 %v4012_v19 }
 0x14d   :  { %1857 = vmatprep.subr.bf16.mxu0 %v3952_v5  ;;  %1906 = vmatprep.subr.bf16.mxu1 %v3952_v5 }
 0x182   :  { %v1385_v21 = vpop.f32.mrb[0].mxu0  ;;  %v4022_v22 = vpop.f32.mrb[0].mxu1 }
 0x183   :  { %v1387_v23 = vpop.f32.mrb[1].mxu0  ;;  %v4024_v24 = vpop.f32.mrb[1].mxu1  ;;  %v1386_v39 = vadd.f32 %v1385_v21, %v324_v35 }
 0x184   :  { %v1389_v25 = vpop.f32.mrb[2].mxu0  ;;  %v4026_v48 = vpop.f32.mrb[2].mxu1  ;;  %v1388_v40 = vadd.f32 %v1387_v23, %v328_v36 }
 0x185   :  { %v1391_v26 = vpop.f32.mrb[3].mxu0  ;;  %v4028_v27 = vpop.f32.mrb[3].mxu1  ;;  %v1390_v43 = vadd.f32 %v1389_v25, %v324_v35  ;;  %v1609_v52 = vmax.f32 %v1386_v39, 0.0  ;;  %v331_v25 = vsub.s32 2, %v4030_v29 }
 0x186   :  { %v1392_v47 = vadd.f32 %v1391_v26, %v328_v36  ;;  %v1610_v57 = vmax.f32 %v1388_v40, 0.0  ;;  %v335_v26 = vsub.s32 3, %v4030_v29  ;;  %v340_v36 = vrot.slane %v4035_v31, %v339_v28 }
 0x187   :  { %v1621_v60 = vmax.f32 %v1390_v43, 0.0  ;;  %v332_v34 = vrot.slane %v4035_v31, %v331_v25 }
 0x188   :  { %v1622_v63 = vmax.f32 %v1392_v47, 0.0  ;;  %v336_v35 = vrot.slane %v4035_v31, %v335_v26 }
 0x189   :  { %v1429_v39 = vadd.f32 %v4022_v22, %v332_v34  ;;  %v1433_v40 = vadd.f32 %v4026_v48, %v332_v34 }
 0x1c2   :  { %v4048_v41 = vpop.f32.mrb[4].mxu0  ;;  %v1514_v42 = vpop.f32.mrb[4].mxu1 }
 0x1c3   :  { %v1515_v44 = vadd.f32 %v1514_v42, %v348_v37  ;;  %v4050_v45 = vpop.f32.mrb[5].mxu0  ;;  %v1516_v46 = vpop.f32.mrb[5].mxu1  ;;  %v1435_v42 = vadd.f32 %v4028_v27, %v336_v35  ;;  %v1472_v43 = vadd.f32 %v4048_v41, %v340_v36 }
 0x1c4   :  { %v1517_v49 = vadd.f32 %v1516_v46, %v352_v38  ;;  %v4052_v50 = vpop.f32.mrb[6].mxu0  ;;  %v1518_v51 = vpop.f32.mrb[6].mxu1 }
 0x1c5   :  { %v1615_v53 = vmax.f32 %v1515_v44, 0.0  ;;  %v1519_v54 = vadd.f32 %v1518_v51, %v348_v37  ;;  %v4054_v55 = vpop.f32.mrb[7].mxu0  ;;  %v1520_v56 = vpop.f32.mrb[7].mxu1  ;;  %v344_v37 = vrot.slane %v4035_v31, %v343_v33  ;;  %v1476_v47 = vadd.f32 %v4052_v50, %v340_v36 }
 0x1c6   :  { %v1616_v58 = vmax.f32 %v1517_v49, 0.0  ;;  %v1521_v59 = vadd.f32 %v1520_v56, %v352_v38  ;;  %v318_v38 = vld [vmem:[#allocation7 + $0x8] sm:$0xf]  ;;  %v1611_v51 = vmax.f32 %v1429_v39, 0.0  ;;  %v1624_v48 = vmax.f32 %v1435_v42, 0.0 }
 0x1c7   :  { %v1633_v61 = vmax.f32 %v1609_v52, %v1615_v53  ;;  %v1627_v62 = vmax.f32 %v1519_v54, 0.0  ;;  %v1474_v29 = vadd.f32 %v4050_v45, %v344_v37  ;;  %v356_v44 = vrot.slane %v318_v38, %v4033_v30 }
 0x1c8   :  { %v1634_v0 = vmax.f32 %v1610_v57, %v1616_v58  ;;  %v1628_v1 = vmax.f32 %v1521_v59, 0.0  ;;  %v364_v46 = vrot.slane %v318_v38, %v331_v25  ;;  %v1478_v31 = vadd.f32 %v4054_v55, %v344_v37 }
 0x1c9   :  { %v1639_v2 = vmax.f32 %v1621_v60, %v1627_v62  ;;  %v360_v49 = vrot.slane %v318_v38, %v4038_v32  ;;  %v368_v22 = vrot.slane %v318_v38, %v335_v26  ;;  %v1623_v52 = vmax.f32 %v1433_v40, 0.0 }
 0x1ca   :  { %v1640_v4 = vmax.f32 %v1622_v63, %v1628_v1  ;;  %v1613_v54 = vmax.f32 %v1472_v43, 0.0  ;;  %v1614_v41 = vmax.f32 %v1474_v29, 0.0  ;;  %v1625_v59 = vmax.f32 %v1476_v47, 0.0 }
 0x1cb   :  { %v1645_v21 = vpack.c.bf16 %v1639_v2, %v1633_v61  ;;  %v1626_v60 = vmax.f32 %v1478_v31, 0.0 }
 0x1cc   :  { %v1646_v23 = vpack.c.bf16 %v1640_v4, %v1634_v0 }
 0x1cd   :  { %1792 = vmatmul.mubr.bf16.vlgmr.msra.gmra.mrb[12].mxu0 %v1645_v21 }
 0x1ce   :  { %1841 = vmatmul.mubr.bf16.vlgmr.msra.gmra.mrb[12].mxu1 %v1646_v23  ;;  %1858 = vmatpush1.bf16.msra.mxu0 %v3954_v6 }
 0x1cf   :  { %1907 = vmatpush1.bf16.msra.mxu1 %v3954_v6  ;;  %1859 = vmatprep.subr.bf16.mxu0 %v3958_v7 }
 0x1d0   :  { %1908 = vmatprep.subr.bf16.mxu1 %v3958_v7  ;;  %1889 = vmatprep.mubr.bf16.mxu0 %v3786_v20 }
 0x1d1   :  { %1938 = vmatprep.mubr.bf16.mxu1 %v3786_v20 }
 0x1d2   :  { %1860 = vmatpush1.bf16.msra.mxu0 %v3964_v8 }
 0x1d3   :  { %1909 = vmatpush1.bf16.msra.mxu1 %v3964_v8  ;;  %1861 = vmatprep.subr.bf16.mxu0 %v3968_v9 }
 0x1d4   :  { %1910 = vmatprep.subr.bf16.mxu1 %v3968_v9 }
 0x1d6   :  { %1862 = vmatpush1.bf16.msra.mxu0 %v3972_v10 }
 0x1d7   :  { %1911 = vmatpush1.bf16.msra.mxu1 %v3972_v10  ;;  %1863 = vmatprep.subr.bf16.mxu0 %v3976_v3 }
 0x1d8   :  { %1912 = vmatprep.subr.bf16.mxu1 %v3976_v3 }
 0x1da   :  { %1864 = vmatpush1.bf16.msra.mxu0 %v3980_v11 }
 0x1db   :  { %1913 = vmatpush1.bf16.msra.mxu1 %v3980_v11  ;;  %1865 = vmatprep.subr.bf16.mxu0 %v3984_v12 }
 0x1dc   :  { %1914 = vmatprep.subr.bf16.mxu1 %v3984_v12 }
 0x1de   :  { %1866 = vmatpush1.bf16.msra.mxu0 %v3988_v13 }
 0x1df   :  { %1915 = vmatpush1.bf16.msra.mxu1 %v3988_v13  ;;  %1867 = vmatprep.subr.bf16.mxu0 %v3992_v14 }
 0x1e0   :  { %1916 = vmatprep.subr.bf16.mxu1 %v3992_v14 }
 0x1e2   :  { %1868 = vmatpush1.bf16.msra.mxu0 %v3996_v15 }
 0x1e3   :  { %1917 = vmatpush1.bf16.msra.mxu1 %v3996_v15  ;;  %1869 = vmatprep.subr.bf16.mxu0 %v4000_v16 }
 0x1e4   :  { %1918 = vmatprep.subr.bf16.mxu1 %v4000_v16 }
 0x1e6   :  { %1870 = vmatpush1.bf16.msra.mxu0 %v4004_v17 }
 0x1e7   :  { %1919 = vmatpush1.bf16.msra.mxu1 %v4004_v17  ;;  %1871 = vmatprep.subr.bf16.mxu0 %v4008_v18 }
 0x1e8   :  { %1920 = vmatprep.subr.bf16.mxu1 %v4008_v18 }
 0x1ea   :  { %1872 = vmatpush1.bf16.msra.mxu0 %v4012_v19 }
 0x1eb   :  { %1921 = vmatpush1.bf16.msra.mxu1 %v4012_v19  ;;  %1955 = vmatprep.subr.bf16.mxu0 %v3952_v5 }
 0x1ec   :  { %2004 = vmatprep.subr.bf16.mxu1 %v3952_v5  ;;  %v1431_v5 = vadd.f32 %v4024_v24, %v336_v35 }
 0x1ee   :  { %v1612_v24 = vmax.f32 %v1431_v5, 0.0 }
 0x202   :  { %v1557_v53 = vpop.f32.mrb[8].mxu0  ;;  %v1600_v27 = vpop.f32.mrb[8].mxu1 }
 0x203   :  { %v1558_v56 = vadd.f32 %v1557_v53, %v356_v44  ;;  %v1601_v45 = vadd.f32 %v1600_v27, %v364_v46  ;;  %v1559_v57 = vpop.f32.mrb[9].mxu0  ;;  %v1602_v58 = vpop.f32.mrb[9].mxu1  ;;  %v3552_v53 = vld [vmem:[#allocation10 + $0x70] sm:$0xff]  }
 0x204   :  { %v1560_v50 = vadd.f32 %v1559_v57, %v360_v49  ;;  %v1603_v61 = vadd.f32 %v1602_v58, %v368_v22  ;;  %v1561_v55 = vpop.f32.mrb[10].mxu0  ;;  %v1604_v62 = vpop.f32.mrb[10].mxu1  ;;  %v3553_v27 = vld [vmem:[#allocation10 + $0x30] sm:$0xff]  }
 0x205   :  { %v1617_v63 = vmax.f32 %v1558_v56, 0.0  ;;  %v1619_v0 = vmax.f32 %v1601_v45, 0.0  ;;  %v1562_v1 = vadd.f32 %v1561_v55, %v356_v44  ;;  %v1605_v2 = vadd.f32 %v1604_v62, %v364_v46  ;;  %v1563_v4 = vpop.f32.mrb[11].mxu0  ;;  %v1606_v21 = vpop.f32.mrb[11].mxu1  ;;  %v3566_v56 = vld [vmem:[#allocation10 + $0xe8] sm:$0xff]   ;;  %v3568_v57 = vld [vmem:[#allocation10 + $0xf0] sm:$0xff]  }
 0x206   :  { %v1618_v23 = vmax.f32 %v1560_v50, 0.0  ;;  %v1620_v25 = vmax.f32 %v1603_v61, 0.0  ;;  %v1564_v26 = vadd.f32 %v1563_v4, %v360_v49  ;;  %v1607_v28 = vadd.f32 %v1606_v21, %v368_v22  ;;  %v3563_v49 = vld [vmem:[#allocation10 + $0x98] sm:$0xff]   ;;  %v3549_v22 = vld [vmem:[#allocation10 + $0x20] sm:$0xff]   ;;  %v3567_v45 = vld [vmem:[#allocation10 + $0xa8] sm:$0xff]  }
 0x207   :  { %v1635_v33 = vmax.f32 %v1611_v51, %v1617_v63  ;;  %v1637_v34 = vmax.f32 %v1613_v54, %v1619_v0  ;;  %v1629_v35 = vmax.f32 %v1562_v1, 0.0  ;;  %v1631_v36 = vmax.f32 %v1605_v2, 0.0  ;;  %v3564_v51 = vld [vmem:[#allocation10 + $0xe0] sm:$0xff]   ;;  %v3554_v54 = vld [vmem:[#allocation10 + $0x78] sm:$0xff]   ;;  %v3569_v58 = vld [vmem:[#allocation10 + $0xb0] sm:$0xff]  }
 0x208   :  { %v1636_v37 = vmax.f32 %v1612_v24, %v1618_v23  ;;  %v1638_v38 = vmax.f32 %v1614_v41, %v1620_v25  ;;  %v1630_v39 = vmax.f32 %v1564_v26, 0.0  ;;  %v1632_v5 = vmax.f32 %v1607_v28, 0.0  ;;  %v3550_v24 = vld [vmem:[#allocation10 + $0x68] sm:$0xff]   ;;  %v3555_v41 = vld [vmem:[#allocation10 + $0x38] sm:$0xff]   ;;  %v3572_v50 = vld [vmem:[#allocation10 + $0x140] sm:$0xff]  }
 0x209   :  { %v1641_v40 = vmax.f32 %v1623_v52, %v1629_v35  ;;  %v1643_v42 = vmax.f32 %v1625_v59, %v1631_v36  ;;  %v3565_v52 = vld [vmem:[#allocation10 + $0xa0] sm:$0xff]   ;;  %v3570_v59 = vld [vmem:[#allocation10 + $0xf8] sm:$0xff]  }
 0x20a   :  { %v1642_v43 = vmax.f32 %v1624_v48, %v1630_v39  ;;  %v1644_v29 = vmax.f32 %v1626_v60, %v1632_v5  ;;  %v3551_v48 = vld [vmem:[#allocation10 + $0x28] sm:$0xff]   ;;  %v3571_v60 = vld [vmem:[#allocation10 + $0xb8] sm:$0xff]   ;;  %v1667_v61 = vld [vmem:[%s4214_s4] sm:$0x3] }
 0x20b   :  { %v1647_v44 = vpack.c.bf16 %v1641_v40, %v1635_v33  ;;  %v1649_v46 = vpack.c.bf16 %v1643_v42, %v1637_v34  ;;  %v4144_v55 = vrot.slane %v1667_v61, %v4033_v30  ;;  %v4147_v62 = vrot.slane %v1667_v61, %v4038_v32 }
 0x20c   :  { %v1648_v47 = vpack.c.bf16 %v1642_v43, %v1636_v37  ;;  %v1650_v31 = vpack.c.bf16 %v1644_v29, %v1638_v38 }
 0x20d   :  { %1890 = vmatmul.mubr.bf16.vlgmr.msra.gmra.mrb[16].mxu0 %v1647_v44 }
 0x20e   :  { %1956 = vmatpush1.bf16.msra.mxu0 %v3954_v6  ;;  %1939 = vmatmul.mubr.bf16.vlgmr.msra.gmra.mrb[16].mxu1 %v1648_v47 }
 0x20f   :  { %2005 = vmatpush1.bf16.msra.mxu1 %v3954_v6  ;;  %1957 = vmatprep.subr.bf16.mxu0 %v3958_v7  ;;  %v3540_v6 = vld [vmem:[#allocation10 + $0x40] sm:$0xff]  }
 0x210   :  { %2006 = vmatprep.subr.bf16.mxu1 %v3958_v7  ;;  %1987 = vmatprep.mubr.bf16.mxu0 %v3786_v20  ;;  %v3541_v7 = vld [vmem:[#allocation10] sm:$0xff]  }
 0x211   :  { %2036 = vmatprep.mubr.bf16.mxu1 %v3786_v20  ;;  %v3548_v20 = vld [vmem:[#allocation10 + $0x60] sm:$0xff]  }
 0x212   :  { %1958 = vmatpush1.bf16.msra.mxu0 %v3964_v8 }
 0x213   :  { %2007 = vmatpush1.bf16.msra.mxu1 %v3964_v8  ;;  %1959 = vmatprep.subr.bf16.mxu0 %v3968_v9  ;;  %v3542_v8 = vld [vmem:[#allocation10 + $0x48] sm:$0xff]  }
 0x214   :  { %2008 = vmatprep.subr.bf16.mxu1 %v3968_v9  ;;  %v3543_v9 = vld [vmem:[#allocation10 + $0x8] sm:$0xff]  }
 0x216   :  { %1960 = vmatpush1.bf16.msra.mxu0 %v3972_v10 }
 0x217   :  { %2009 = vmatpush1.bf16.msra.mxu1 %v3972_v10  ;;  %1961 = vmatprep.subr.bf16.mxu0 %v3976_v3  ;;  %v3556_v10 = vld [vmem:[#allocation10 + $0xc0] sm:$0xff]  }
 0x218   :  { %2010 = vmatprep.subr.bf16.mxu1 %v3976_v3  ;;  %v3557_v3 = vld [vmem:[#allocation10 + $0x80] sm:$0xff]  }
 0x21a   :  { %1962 = vmatpush1.bf16.msra.mxu0 %v3980_v11 }
 0x21b   :  { %2011 = vmatpush1.bf16.msra.mxu1 %v3980_v11  ;;  %1963 = vmatprep.subr.bf16.mxu0 %v3984_v12  ;;  %v3558_v11 = vld [vmem:[#allocation10 + $0xc8] sm:$0xff]  }
 0x21c   :  { %2012 = vmatprep.subr.bf16.mxu1 %v3984_v12  ;;  %v3544_v12 = vld [vmem:[#allocation10 + $0x50] sm:$0xff]  }
 0x21e   :  { %1964 = vmatpush1.bf16.msra.mxu0 %v3988_v13 }
 0x21f   :  { %2013 = vmatpush1.bf16.msra.mxu1 %v3988_v13  ;;  %1965 = vmatprep.subr.bf16.mxu0 %v3992_v14  ;;  %v3559_v13 = vld [vmem:[#allocation10 + $0x88] sm:$0xff]  }
 0x220   :  { %2014 = vmatprep.subr.bf16.mxu1 %v3992_v14  ;;  %v3545_v14 = vld [vmem:[#allocation10 + $0x10] sm:$0xff]  }
 0x222   :  { %1966 = vmatpush1.bf16.msra.mxu0 %v3996_v15 }
 0x223   :  { %2015 = vmatpush1.bf16.msra.mxu1 %v3996_v15  ;;  %1967 = vmatprep.subr.bf16.mxu0 %v4000_v16  ;;  %v3560_v15 = vld [vmem:[#allocation10 + $0xd0] sm:$0xff]  }
 0x224   :  { %2016 = vmatprep.subr.bf16.mxu1 %v4000_v16  ;;  %v3546_v16 = vld [vmem:[#allocation10 + $0x58] sm:$0xff]  }
 0x226   :  { %1968 = vmatpush1.bf16.msra.mxu0 %v4004_v17 }
 0x227   :  { %2017 = vmatpush1.bf16.msra.mxu1 %v4004_v17  ;;  %1969 = vmatprep.subr.bf16.mxu0 %v4008_v18  ;;  %v3561_v17 = vld [vmem:[#allocation10 + $0x90] sm:$0xff]  }
 0x228   :  { %2018 = vmatprep.subr.bf16.mxu1 %v4008_v18  ;;  %v3547_v18 = vld [vmem:[#allocation10 + $0x18] sm:$0xff]  }
 0x22a   :  { %1970 = vmatpush1.bf16.msra.mxu0 %v4012_v19 }
 0x22b   :  { %2019 = vmatpush1.bf16.msra.mxu1 %v4012_v19  ;;  %3102 = vmatprep.subr.bf16.mxu0 %v3540_v6  ;;  %v3562_v19 = vld [vmem:[#allocation10 + $0xd8] sm:$0xff]  }
 0x22c   :  { %3124 = vmatprep.subr.bf16.mxu1 %v3556_v10  ;;  %v3575_v10 = vld [vmem:[#allocation10 + $0x108] sm:$0xff]  }
 0x22d   :  { %1988 = vmatmul.mubr.bf16.vlgmr.msra.gmra.mrb[20].mxu0 %v1649_v46 }
 0x22e   :  { %2037 = vmatmul.mubr.bf16.vlgmr.msra.gmra.mrb[20].mxu1 %v1650_v31  ;;  %3103 = vmatpush3.bf16.msra.mxu0 %v3541_v7 }
 0x22f   :  { %3104 = vmatprep.subr.bf16.mxu0 %v3542_v8  ;;  %3125 = vmatpush3.bf16.msra.mxu1 %v3557_v3  ;;  %v3573_v8 = vld [vmem:[#allocation10 + $0x100] sm:$0xff]   ;;  %v3576_v3 = vld [vmem:[#allocation10 + $0x150] sm:$0xff]  }
 0x230   :  { %3126 = vmatprep.subr.bf16.mxu1 %v3558_v11  ;;  %v3577_v11 = vld [vmem:[#allocation10 + $0x110] sm:$0xff]  }
 0x232   :  { %3105 = vmatpush3.bf16.msra.mxu0 %v3543_v9  ;;  %v3574_v9 = vld [vmem:[#allocation10 + $0x148] sm:$0xff]  }
 0x233   :  { %3106 = vmatprep.subr.bf16.mxu0 %v3544_v12  ;;  %3127 = vmatpush3.bf16.msra.mxu1 %v3559_v13  ;;  %v3578_v12 = vld [vmem:[#allocation10 + $0x158] sm:$0xff]  }
 0x234   :  { %3128 = vmatprep.subr.bf16.mxu1 %v3560_v15  ;;  %v3579_v13 = vld [vmem:[#allocation10 + $0x118] sm:$0xff]   ;;  %v3581_v15 = vld [vmem:[#allocation10 + $0x120] sm:$0xff]  }
 0x236   :  { %3107 = vmatpush3.bf16.msra.mxu0 %v3545_v14  ;;  %v3580_v14 = vld [vmem:[#allocation10 + $0x160] sm:$0xff]  }
 0x237   :  { %3108 = vmatprep.subr.bf16.mxu0 %v3546_v16  ;;  %3129 = vmatpush3.bf16.msra.mxu1 %v3561_v17  ;;  %v3582_v16 = vld [vmem:[#allocation10 + $0x168] sm:$0xff]  }
 0x238   :  { %3130 = vmatprep.subr.bf16.mxu1 %v3562_v19  ;;  %v3583_v17 = vld [vmem:[#allocation10 + $0x128] sm:$0xff]   ;;  %v3585_v19 = vld [vmem:[#allocation10 + $0x130] sm:$0xff]  }
 0x23a   :  { %3109 = vmatpush3.bf16.msra.mxu0 %v3547_v18  ;;  %v3584_v18 = vld [vmem:[#allocation10 + $0x170] sm:$0xff]  }
 0x23b   :  { %3110 = vmatprep.subr.bf16.mxu0 %v3548_v20  ;;  %3131 = vmatpush3.bf16.msra.mxu1 %v3563_v49  ;;  %v3586_v20 = vld [vmem:[#allocation10 + $0x178] sm:$0xff]  }
 0x23c   :  { %3132 = vmatprep.subr.bf16.mxu1 %v3564_v51  ;;  %v3587_v49 = vld [vmem:[#allocation10 + $0x138] sm:$0xff]  }
 0x23e   :  { %3111 = vmatpush3.bf16.msra.mxu0 %v3549_v22 }
 0x23f   :  { %3112 = vmatprep.subr.bf16.mxu0 %v3550_v24  ;;  %3133 = vmatpush3.bf16.msra.mxu1 %v3565_v52 }
 0x240   :  { %3134 = vmatprep.subr.bf16.mxu1 %v3566_v56 }
 0x242   :  { %3113 = vmatpush3.bf16.msra.mxu0 %v3551_v48 }
 0x243   :  { %3114 = vmatprep.subr.bf16.mxu0 %v3552_v53  ;;  %3135 = vmatpush3.bf16.msra.mxu1 %v3567_v45 }
 0x244   :  { %3136 = vmatprep.subr.bf16.mxu1 %v3568_v57 }
 0x246   :  { %3115 = vmatpush3.bf16.msra.mxu0 %v3553_v27 }
 0x247   :  { %3116 = vmatprep.subr.bf16.mxu0 %v3554_v54  ;;  %3137 = vmatpush3.bf16.msra.mxu1 %v3569_v58 }
 0x248   :  { %3138 = vmatprep.subr.bf16.mxu1 %v3570_v59 }
 0x24a   :  { %3117 = vmatpush3.bf16.msra.mxu0 %v3555_v41 }
 0x24b   :  { %3139 = vmatpush3.bf16.msra.mxu1 %v3571_v60  ;;  %3146 = vmatprep.subr.bf16.mxu0 %v3572_v50 }
 0x2a0   :  { %v1793_v63 = vpop.f32.mrb[12].mxu0 }
 0x2a1   :  { %v1794_v0 = vadd.f32 %v1793_v63, %v4144_v55  ;;  %v1795_v1 = vpop.f32.mrb[13].mxu0  ;;  %v1842_v2 = vpop.f32.mrb[12].mxu1 }
 0x2a2   :  { %v1796_v4 = vadd.f32 %v1795_v1, %v4147_v62  ;;  %v1843_v21 = vadd.f32 %v1842_v2, %v4144_v55  ;;  %v1797_v23 = vpop.f32.mrb[14].mxu0  ;;  %v1844_v25 = vpop.f32.mrb[13].mxu1 }
 0x2a3   :  { %v1802_v26 = vmax.f32 %v1794_v0, 0.0  ;;  %v1798_v28 = vadd.f32 %v1797_v23, %v4144_v55  ;;  %v1845_v30 = vadd.f32 %v1844_v25, %v4147_v62  ;;  %v1799_v33 = vpop.f32.mrb[15].mxu0  ;;  %v1846_v34 = vpop.f32.mrb[14].mxu1 }
 0x2a4   :  { %v1803_v32 = vmax.f32 %v1796_v4, 0.0  ;;  %v1851_v35 = vmax.f32 %v1843_v21, 0.0  ;;  %v1800_v36 = vadd.f32 %v1799_v33, %v4147_v62  ;;  %v1847_v37 = vadd.f32 %v1846_v34, %v4144_v55  ;;  %v1848_v38 = vpop.f32.mrb[15].mxu1 }
 0x2a5   :  { %v1804_v39 = vmax.f32 %v1798_v28, 0.0  ;;  %v1852_v5 = vmax.f32 %v1845_v30, 0.0  ;;  %v1849_v40 = vadd.f32 %v1848_v38, %v4147_v62 }
 0x2a6   :  { %v1806_v42 = vmax.f32 %v1802_v26, %v1803_v32  ;;  %v1805_v43 = vmax.f32 %v1800_v36, 0.0  ;;  %v1853_v29 = vmax.f32 %v1847_v37, 0.0 }
 0x2a7   :  { %v1855_v44 = vmax.f32 %v1851_v35, %v1852_v5  ;;  %v1854_v46 = vmax.f32 %v1849_v40, 0.0 }
 0x2a8   :  { %v1807_v47 = vmax.f32 %v1804_v39, %v1805_v43 }
 0x2a9   :  { %v1856_v31 = vmax.f32 %v1853_v29, %v1854_v46 }
 0x2aa   :  { %v2053_v6 = vpack.c.bf16 %v1807_v47, %v1806_v42 }
 0x2ab   :  { %v2054_v7 = vpack.c.bf16 %v1856_v31, %v1855_v44 }
 0x2ad   :  { %2482 = vmatprep.mubr.bf16.mxu0 %v2054_v7 }
 0x2ae   :  { %2483 = vmatmul.mubr.bf16.vlgmr.msra.gmra.mrb[24].mxu0 %v2053_v6 }
 0x2af   :  { %3147 = vmatpush3.bf16.msra.mxu0 %v3573_v8 }
 0x2b0   :  { %3148 = vmatprep.subr.bf16.mxu0 %v3574_v9 }
 0x2b3   :  { %3149 = vmatpush3.bf16.msra.mxu0 %v3575_v10 }
 0x2b4   :  { %3150 = vmatprep.subr.bf16.mxu0 %v3576_v3 }
 0x2b7   :  { %3151 = vmatpush3.bf16.msra.mxu0 %v3577_v11 }
 0x2b8   :  { %3152 = vmatprep.subr.bf16.mxu0 %v3578_v12 }
 0x2bb   :  { %3153 = vmatpush3.bf16.msra.mxu0 %v3579_v13 }
 0x2bc   :  { %3154 = vmatprep.subr.bf16.mxu0 %v3580_v14 }
 0x2bf   :  { %3155 = vmatpush3.bf16.msra.mxu0 %v3581_v15 }
 0x2c0   :  { %3156 = vmatprep.subr.bf16.mxu0 %v3582_v16 }
 0x2c3   :  { %3157 = vmatpush3.bf16.msra.mxu0 %v3583_v17 }
 0x2c4   :  { %3158 = vmatprep.subr.bf16.mxu0 %v3584_v18 }
 0x2c7   :  { %3159 = vmatpush3.bf16.msra.mxu0 %v3585_v19 }
 0x2c8   :  { %3160 = vmatprep.subr.bf16.mxu0 %v3586_v20 }
 0x2cb   :  { %3161 = vmatpush3.bf16.msra.mxu0 %v3587_v49 }
 0x2e0   :  { %v1891_v22 = vpop.f32.mrb[16].mxu0 }
 0x2e1   :  { %v1892_v51 = vadd.f32 %v1891_v22, %v4144_v55  ;;  %v1893_v24 = vpop.f32.mrb[17].mxu0  ;;  %v1940_v52 = vpop.f32.mrb[16].mxu1 }
 0x2e2   :  { %v1894_v48 = vadd.f32 %v1893_v24, %v4147_v62  ;;  %v1941_v53 = vadd.f32 %v1940_v52, %v4144_v55  ;;  %v1895_v27 = vpop.f32.mrb[18].mxu0  ;;  %v1942_v54 = vpop.f32.mrb[17].mxu1 }
 0x2e3   :  { %v1900_v41 = vmax.f32 %v1892_v51, 0.0  ;;  %v1896_v56 = vadd.f32 %v1895_v27, %v4144_v55  ;;  %v1943_v45 = vadd.f32 %v1942_v54, %v4147_v62  ;;  %v1897_v57 = vpop.f32.mrb[19].mxu0  ;;  %v1944_v58 = vpop.f32.mrb[18].mxu1 }
 0x2e4   :  { %v1901_v59 = vmax.f32 %v1894_v48, 0.0  ;;  %v1949_v60 = vmax.f32 %v1941_v53, 0.0  ;;  %v1898_v50 = vadd.f32 %v1897_v57, %v4147_v62  ;;  %v1945_v61 = vadd.f32 %v1944_v58, %v4144_v55  ;;  %v1946_v63 = vpop.f32.mrb[19].mxu1 }
 0x2e5   :  { %v1902_v0 = vmax.f32 %v1896_v56, 0.0  ;;  %v1950_v1 = vmax.f32 %v1943_v45, 0.0  ;;  %v1947_v2 = vadd.f32 %v1946_v63, %v4147_v62 }
 0x2e6   :  { %v1904_v4 = vmax.f32 %v1900_v41, %v1901_v59  ;;  %v1903_v21 = vmax.f32 %v1898_v50, 0.0  ;;  %v1951_v23 = vmax.f32 %v1945_v61, 0.0 }
 0x2e7   :  { %v1953_v25 = vmax.f32 %v1949_v60, %v1950_v1  ;;  %v1952_v26 = vmax.f32 %v1947_v2, 0.0 }
 0x2e8   :  { %v1905_v28 = vmax.f32 %v1902_v0, %v1903_v21 }
 0x2e9   :  { %v1954_v30 = vmax.f32 %v1951_v23, %v1952_v26 }
 0x2ea   :  { %v2055_v33 = vpack.c.bf16 %v1905_v28, %v1904_v4 }
 0x2eb   :  { %v2056_v34 = vpack.c.bf16 %v1954_v30, %v1953_v25  ;;  %v3088_v30 = vld [vmem:[%s4217_s7] ss:$0 sm:$0xff] }
 0x2ed   :  { %2523 = vmatprep.mubr.bf16.mxu1 %v2056_v34 }
 0x2ee   :  { %2524 = vmatmul.mubr.bf16.vlgmr.msra.gmra.mrb[24].mxu1 %v2055_v33 }
 0x300   :  { %v1989_v32 = vpop.f32.mrb[20].mxu0 }
 0x301   :  { %v1990_v35 = vadd.f32 %v1989_v32, %v4144_v55  ;;  %v1991_v36 = vpop.f32.mrb[21].mxu0  ;;  %v2038_v37 = vpop.f32.mrb[20].mxu1 }
 0x302   :  { %v1992_v38 = vadd.f32 %v1991_v36, %v4147_v62  ;;  %v2039_v39 = vadd.f32 %v2038_v37, %v4144_v55  ;;  %v1993_v5 = vpop.f32.mrb[22].mxu0  ;;  %v2040_v40 = vpop.f32.mrb[21].mxu1 }
 0x303   :  { %v1998_v42 = vmax.f32 %v1990_v35, 0.0  ;;  %v1994_v43 = vadd.f32 %v1993_v5, %v4144_v55  ;;  %v2041_v29 = vadd.f32 %v2040_v40, %v4147_v62  ;;  %v1995_v44 = vpop.f32.mrb[23].mxu0  ;;  %v2042_v46 = vpop.f32.mrb[22].mxu1  ;;  %v3588_v5 = vld [vmem:[%s4218_s8] sm:$0xff]   ;;  %v3787_v40 = vmov 0.0  }
 0x304   :  { %v1999_v47 = vmax.f32 %v1992_v38, 0.0  ;;  %v2047_v31 = vmax.f32 %v2039_v39, 0.0  ;;  %v1996_v6 = vadd.f32 %v1995_v44, %v4147_v62  ;;  %v2043_v7 = vadd.f32 %v2042_v46, %v4144_v55  ;;  %v2044_v8 = vpop.f32.mrb[23].mxu1  ;;  %3180 = vmatprep.subr.bf16.mxu1 %v3787_v40  ;;  %3184 = vmatprep.mubr.msk.bf16.mxu1 %vm3788_vm0, %v3787_v40 }
 0x305   :  { %v2000_v9 = vmax.f32 %v1994_v43, 0.0  ;;  %v2048_v10 = vmax.f32 %v2041_v29, 0.0  ;;  %v2045_v3 = vadd.f32 %v2044_v8, %v4147_v62  ;;  %v3037_v62 = vld [vmem:[%s4216_s6] ss:$0 sm:$0xff]  ;;  %3181 = vmatpush3.bf16.msra.mxu1 %v3588_v5 }
 0x306   :  { %v2002_v11 = vmax.f32 %v1998_v42, %v1999_v47  ;;  %v2001_v12 = vmax.f32 %v1996_v6, 0.0  ;;  %v2049_v13 = vmax.f32 %v2043_v7, 0.0  ;;  %v3589_v42 = vld [vmem:[%s4218_s8 + $0x8] sm:$0xff]   ;;  %3182 = vmatprep.subr.bf16.mxu1 %v3787_v40 }
 0x307   :  { %v2051_v14 = vmax.f32 %v2047_v31, %v2048_v10  ;;  %v2050_v15 = vmax.f32 %v2045_v3, 0.0  ;;  %v3591_v3 = vld [vmem:[#allocation11 + $0x8] sm:$0xff]  }
 0x308   :  { %v2003_v16 = vmax.f32 %v2000_v9, %v2001_v12  ;;  %v3590_v9 = vld [vmem:[#allocation11] sm:$0xff]   ;;  %v3593_v12 = vld [vmem:[#allocation11 + $0x18] sm:$0xff]  }
 0x309   :  { %v2052_v17 = vmax.f32 %v2049_v13, %v2050_v15  ;;  %3183 = vmatpush3.bf16.msra.mxu1 %v3589_v42  ;;  %v3594_v13 = vld [vmem:[#allocation11 + $0x20] sm:$0xff]   ;;  %v3596_v15 = vld [vmem:[#allocation11 + $0x30] sm:$0xff]  }
 0x30a   :  { %v2057_v18 = vpack.c.bf16 %v2003_v16, %v2002_v11  ;;  %3188 = vmatprep.subr.bf16.mxu1 %v3787_v40  ;;  %v3592_v11 = vld [vmem:[#allocation11 + $0x10] sm:$0xff]   ;;  %v3597_v16 = vld [vmem:[#allocation11 + $0x38] sm:$0xff]  }
 0x30b   :  { %v2058_v19 = vpack.c.bf16 %v2052_v17, %v2051_v14  ;;  %v3595_v14 = vld [vmem:[#allocation11 + $0x28] sm:$0xff]   ;;  %v3089_v17 = vld [vmem:[%s4219_s9] ss:$0 sm:$0xff]  ;;  %s3742_s9 = scalar_lea.vmem %s2813_s16, 256 }
 0x30c   :  { %p3743_p6 = scmp.ne.s32.totalorder %s2813_s16, %s3742_s9  ;;  %p3748_p8 = scmp.lt.s32.totalorder %s3742_s9, %s3742_s9 }
 0x30d   :  { %2564 = vmatprep.mubr.bf16.mxu0 %v2058_v19 }
 0x30e   :  { %2565 = vmatmul.mubr.bf16.vlgmr.msra.gmra.mrb[28].mxu0 %v2057_v18  ;;  %p3749_p9 = por %p3748_p8, %p3747_p7 }
 0x310   :  { %p3750_p10 = pnand %p3749_p9, %p3743_p6 }
 0x381   :  { %v3118_v20 = vpop.f32.mrb[24].mxu0 }
 0x382   :  { %v3119_v49 = vpop.f32.mrb[25].mxu0 }
 0x383   :  { %v3120_v22 = vadd.f32 %v3119_v49, %v3118_v20  ;;  %v3121_v55 = vpop.f32.mrb[26].mxu0 }
 0x384   :  { %v3122_v51 = vpop.f32.mrb[27].mxu0 }
 0x385   :  { %v3123_v24 = vadd.f32 %v3122_v51, %v3121_v55  ;;  %v2485_v53 = vadd.f32 %v3120_v22, %v3037_v62 }
 0x387   :  { %v2488_v56 = vadd.f32 %v3123_v24, %v3037_v62 }
 0x3c1   :  { %v3140_v52 = vpop.f32.mrb[24].mxu1 }
 0x3c2   :  { %v3141_v48 = vpop.f32.mrb[25].mxu1 }
 0x3c3   :  { %v3142_v27 = vadd.f32 %v3141_v48, %v3140_v52  ;;  %v3143_v54 = vpop.f32.mrb[26].mxu1  ;;  %v3093_v52 = vld [vmem:[%s4221_s11] ss:$0 sm:$0xff] }
 0x3c4   :  { %v3144_v41 = vpop.f32.mrb[27].mxu1 }
 0x3c5   :  { %v2526_v45 = vadd.f32 %v3142_v27, %v2485_v53  ;;  %v3145_v57 = vadd.f32 %v3144_v41, %v3143_v54 }
 0x3c7   :  { %v2529_v58 = vadd.f32 %v3145_v57, %v2488_v56 }
 0x3e1   :  { %v3162_v59 = vpop.f32.mrb[28].mxu0 }
 0x3e2   :  { %v3163_v60 = vpop.f32.mrb[29].mxu0 }
 0x3e3   :  { %v3164_v50 = vadd.f32 %v3163_v60, %v3162_v59  ;;  %v3165_v61 = vpop.f32.mrb[30].mxu0 }
 0x3e4   :  { %v3166_v63 = vpop.f32.mrb[31].mxu0 }
 0x3e5   :  { %v2567_v0 = vadd.f32 %v3164_v50, %v2526_v45  ;;  %v3167_v1 = vadd.f32 %v3166_v63, %v3165_v61 }
 0x3e7   :  { %v3086_v2 = vmul.f32 -1.442695, %v2567_v0  ;;  %v2570_v4 = vadd.f32 %v3167_v1, %v2529_v58 }
 0x3e9   :  { %3598 = vpow2.f32 %v3086_v2  ;;  %v3087_v21 = vmul.f32 -1.442695, %v2570_v4 }
 0x3eb   :  { %3600 = vpow2.f32 %v3087_v21 }
 0x3f3   :  { %v3599_v23 = vpop.eup %3598 }
 0x3f4   :  { %v2579_v25 = vadd.f32 1.0, %v3599_v23 }
 0x3f5   :  { %v3601_v26 = vpop.eup %3600 }
 0x3f6   :  { %3602 = vrcp.f32 %v2579_v25  ;;  %v2580_v28 = vadd.f32 1.0, %v3601_v26 }
 0x3f8   :  { %3604 = vrcp.f32 %v2580_v28 }
 0x400   :  { %v3603_v33 = vpop.eup %3602 }
 0x401   :  { %v2592_v34 = vmul.f32 %v3603_v33, %v3088_v30  ;;  %v2606_v46 = vsub.f32 1.0, %v3603_v33 }
 0x402   :  { %v3605_v32 = vpop.eup %3604 }
 0x403   :  { %2596 = vrot.lane.b32.xlu0 %v2592_v34, %s3783_s2  ;;  %v2593_v35 = vmul.f32 %v3605_v32, %v3088_v30  ;;  %v2607_v47 = vsub.f32 1.0, %v3605_v32 }
 0x407   :  { %2598 = vrot.lane.b32.xlu0 %v2593_v35, %s3783_s2  ;;  %s3789_s2 = smov 96  }
 0x475   :  { %v2597_v36 = vpop.permute.xlu0 %2596 }
 0x476   :  { %v2602_v37 = vadd.f32 %v2597_v36, %v2567_v0 }
 0x478   :  { %3606 = vtanh.f32 %v2602_v37 }
 0x479   :  { %v2599_v38 = vpop.permute.xlu0 %2598 }
 0x47a   :  { %v2603_v39 = vadd.f32 %v2599_v38, %v2570_v4 }
 0x47c   :  { %3608 = vtanh.f32 %v2603_v39 }
 0x482   :  { %v3607_v43 = vpop.eup %3606 }
 0x483   :  { %2610 = vrot.lane.b32.xlu1 %v3607_v43, %s3789_s2 }
 0x486   :  { %v3609_v29 = vpop.eup %3608 }
 0x487   :  { %2612 = vrot.lane.b32.xlu1 %v3609_v29, %s3789_s2 }
 0x4f5   :  { %v2611_v44 = vpop.permute.xlu1 %2610 }
 0x4f6   :  { %v2616_v6 = vmul.f32 %v2611_v44, %v2606_v46 }
 0x4f9   :  { %v2613_v31 = vpop.permute.xlu1 %2612 }
 0x4fa   :  { %v2617_v7 = vmul.f32 %v2613_v31, %v2607_v47 }
 0x4fc   :  { %v2618_v8 = vpack.c.bf16 %v2617_v7, %v2616_v6 }
 0x4fe   :  { %2631 = vrot.lane.b32.xlu0 %v2618_v8, %s3789_s2 }
 0x570   :  { %v2632_v10 = vpop.permute.xlu0 %2631 }
 0x571   :  { %3185 = vmatmul.mubr.msk.bf16.vlgmr.msra.gmra.mrb[28].mxu1 %vm2645_vm1, %v2632_v10 }
 0x572   :  { %3189 = vmatpush3.bf16.msra.mxu1 %v3590_v9  ;;  %3204 = vmatprep.mubr.msk.bf16.mxu1 %vm3788_vm0, %v3787_v40 }
 0x573   :  { %3190 = vmatprep.subr.bf16.mxu1 %v3787_v40 }
 0x576   :  { %3191 = vmatpush3.bf16.msra.mxu1 %v3591_v3 }
 0x577   :  { %3192 = vmatprep.subr.bf16.mxu1 %v3787_v40 }
 0x57a   :  { %3193 = vmatpush3.bf16.msra.mxu1 %v3592_v11 }
 0x57b   :  { %3194 = vmatprep.subr.bf16.mxu1 %v3787_v40 }
 0x57e   :  { %3195 = vmatpush3.bf16.msra.mxu1 %v3593_v12 }
 0x57f   :  { %3196 = vmatprep.subr.bf16.mxu1 %v3787_v40 }
 0x582   :  { %3197 = vmatpush3.bf16.msra.mxu1 %v3594_v13 }
 0x583   :  { %3198 = vmatprep.subr.bf16.mxu1 %v3787_v40 }
 0x586   :  { %3199 = vmatpush3.bf16.msra.mxu1 %v3595_v14 }
 0x587   :  { %3200 = vmatprep.subr.bf16.mxu1 %v3787_v40 }
 0x58a   :  { %3201 = vmatpush3.bf16.msra.mxu1 %v3596_v15 }
 0x58b   :  { %3202 = vmatprep.subr.bf16.mxu1 %v3787_v40 }
 0x58e   :  { %3203 = vmatpush3.bf16.msra.mxu1 %v3597_v16 }
 0x644   :  { %v2683_v18 = vpop.f32.mrb[28].mxu1 }
 0x645   :  { %v2684_v19 = vadd.f32 %v3089_v17, %v2683_v18  ;;  %v3186_v20 = vpop.f32.mrb[29].mxu1 }
 0x646   :  { %v2686_v49 = vpop.f32.mrb[30].mxu1 }
 0x647   :  { %v2687_v22 = vadd.f32 %v3089_v17, %v2686_v49  ;;  %v3187_v55 = vpop.f32.mrb[31].mxu1  ;;  %v2690_v51 = vmax.f32 %v2684_v19, 0.0 }
 0x649   :  { %v2691_v24 = vmax.f32 %v2687_v22, 0.0 }
 0x64b   :  { %v2692_v62 = vpack.c.bf16 %v2691_v24, %v2690_v51 }
 0x64d   :  { %3205 = vmatmul.mubr.bf16.vlgmr.msra.gmra.mrb[32].mxu1 %v2692_v62 }
 0x720   :  { %v2798_v48 = vpop.f32.mrb[32].mxu1 }
 0x721   :  { %v2799_v53 = vadd.f32 %v3093_v52, %v2798_v48  ;;  %v3206_v27 = vpop.f32.mrb[33].mxu1 }
 0x722   :  { %v2801_v54 = vpop.f32.mrb[34].mxu1 }
 0x723   :  { %2805 = vst [vmem:[#allocation13] sm:$0xff] %v2799_v53  ;;  %v2802_v41 = vadd.f32 %v3093_v52, %v2801_v54  ;;  %v3207_v56 = vpop.f32.mrb[35].mxu1 }
 0x725   :  { %2806 = vst [vmem:[#allocation13 + $0x8] sm:$0xff] %v2802_v41 }
 0x726   :  { %3753 = shalt.err (!%p3750_p10)
}
 0x727   :  { %s3754_s0 = scalar_lea.hbm %s4222_s12, 256 }
 0x728   :  { %p3755_p11 = scmp.ne.s32.totalorder %s4222_s12, %s3754_s0  ;;  %p3758_p12 = scmp.lt.u32.totalorder %s3754_s0, %s4222_s12 }
 0x72a   :  { %p3760_p13 = pnand %p3758_p12, %p3755_p11 }
 0x72c   :  { %3763 = shalt.err (!%p3760_p13)
}
 0x72d   :  { %2818 = dma.vmem_to_hbm [thread:$0]  %s2813_s16, 256, %s4222_s12, [#allocation4], %s3779_s22, %s3779_s22, %s3780_s29  }
 0x72e   :  { %3772 = dma.done.wait [#allocation4], 256  }
 0x72f   :  { %3773 = vsyncadd [#allocation4], 4294967040 }
 0x730   :  { %2822 = vsyncpa [#allocation3], 1 }
 0x731   :  { %2823 = vsyncpa [#allocation6], 1 }
 0x732   :  { %2824 = vsyncpa [#allocation9], 1 }
 0x733   :  { %2825 = vsyncpa [#allocation12], 1 }
 0x734   :  { %2826 = vsyncpa [#allocation4], 1 }

</bundles_post_ra>
